<compile_context>
chip_gen: v7x
topology: tpu7x:2x2x1
jax: 0.10.0
libtpu: 0.0.40
codegen_flags: <defaults>
</compile_context>

<pallas_src>
import numpy as np
import jax
import jax.numpy as jnp
from jax import lax
from jax.experimental import pallas as pl
from jax.experimental.pallas import tpu as pltpu

K = 5      # conv kernel size
PAD = 2    # "same" padding for k=5


def _round_up(x, m):
    return (x + m - 1) // m * m


# ----------------------------------------------------------------------------
# One-time weight repacking (wrapper side, layout only).
# ----------------------------------------------------------------------------
def _selector(w_sp):
    """S[dx, x, w] = 1 if input column x feeds output column w through tap dx."""
    s = np.zeros((K, w_sp, w_sp), np.float32)
    for dx in range(K):
        for wo in range(w_sp):
            x = wo + dx - PAD
            if 0 <= x < w_sp:
                s[dx, x, wo] = 1.0
    return s


def _toeplitz_weight(conv_w, w_sp, in_stride, out_stride, l_plane):
    """(Cout,Cin,K,K) -> (K*l_plane, w_sp*out_stride) bf16 block-Toeplitz matrix.

    Row index      = dy*l_plane + x*in_stride + ci   (x = input spatial column)
    Column index   = w*out_stride + co               (w = output spatial column)
    dx taps and horizontal zero padding are folded into the band structure;
    lane-sparse inputs (in_stride > Cin) and padded output channel strides
    (out_stride > Cout) get zero rows/columns.
    """
    cout, cin = conv_w.shape[0], conv_w.shape[1]
    sel = jnp.asarray(_selector(w_sp))
    a = jnp.einsum("oidk,kxw->dxiwo", conv_w.astype(jnp.float32), sel)
    a = jnp.pad(a, ((0, 0), (0, 0), (0, in_stride - cin),
                    (0, 0), (0, out_stride - cout)))
    t = a.reshape(K, w_sp * in_stride, w_sp * out_stride)
    t = jnp.pad(t, ((0, 0), (0, l_plane - w_sp * in_stride), (0, 0)))
    return t.reshape(K * l_plane, w_sp * out_stride).astype(jnp.bfloat16)


def _bias_row(b, out_stride, w_sp):
    bb = jnp.pad(b.astype(jnp.float32), (0, out_stride - b.shape[0]))
    return jnp.tile(bb, w_sp).reshape(1, w_sp * out_stride)


def _pick_batch_block(n):
    """Largest multiple-of-8 divisor of n, capped at 128, with grid >= 2 when
    n >= 16 (so v7x's two TensorCores both get work)."""
    if n <= 8:
        return n
    limit = n // 2 if n >= 16 else n
    best = None
    b = 8
    while b <= min(128, limit):
        if n % b == 0:
            best = b
        b += 8
    return best if best is not None else n


# ----------------------------------------------------------------------------
# Fused forward.
# ----------------------------------------------------------------------------
def proxprop_convnet_forward(x_nchw, params):
    N, Cin, H, W = x_nchw.shape
    C1, C2, C3, NCLS = 16, 20, 20, 10
    assert H % 4 == 0 and W % 4 == 0
    H2, W2 = H // 2, W // 2
    H3, W3 = H // 4, W // 4

    # Lane strides of valid channel groups entering / leaving each conv.
    S2_IN = 2 * C1       # after pool1: valid groups every 32 lanes (Cin=16)
    S2_OUT = 32          # conv2 output channel stride (C2=20 padded to 32)
    S3_IN = 2 * S2_OUT   # after pool2: valid groups every 64 lanes (Cin=20)
    S3_OUT = 32          # conv3 output channel stride (C3=20 padded to 32)

    L1 = _round_up(W * Cin, 128)   # input plane lane width (64 -> 128)
    N1 = W * C1                    # conv1 output lanes  (256)
    N2 = W2 * S2_OUT               # conv2 output lanes  (256)
    N3 = W3 * S3_OUT               # conv3 output lanes  (128)

    # --- Toeplitz conv weights, lane-tiled biases, flatten-folded FC weight ---
    w1 = _toeplitz_weight(params["conv1_w"], W, Cin, C1, L1)          # (5*L1, N1)
    w2 = _toeplitz_weight(params["conv2_w"], W2, S2_IN, S2_OUT, N1)   # (5*N1, N2)
    w3 = _toeplitz_weight(params["conv3_w"], W3, S3_IN, S3_OUT, N2)   # (5*N2, N3)
    b1 = _bias_row(params["conv1_b"], C1, W)
    b2 = _bias_row(params["conv2_b"], S2_OUT, W2)
    b3 = _bias_row(params["conv3_b"], S3_OUT, W3)
    # PyTorch flattens NCHW: fc_w[n, c*H3*W3 + h*W3 + w]; kernel flattens (h,w,c)
    # with channel stride S3_OUT -> fold the permutation + padding into wfc.
    wfc = jnp.transpose(params["fc_w"].reshape(NCLS, C3, H3, W3), (2, 3, 1, 0))
    wfc = jnp.pad(wfc, ((0, 0), (0, 0), (0, S3_OUT - C3), (0, 0)))
    wfc = wfc.reshape(H3 * W3 * S3_OUT, NCLS).astype(jnp.bfloat16)    # (H3*N3,10)
    bfc = params["fc_b"].reshape(1, NCLS).astype(jnp.float32)

    # --- input: NCHW -> (h, n, w*c) with the lane dim padded to 128, bf16 ------
    xt = jnp.transpose(x_nchw, (2, 0, 3, 1)).reshape(H, N, W * Cin)
    xt = jnp.pad(xt, ((0, 0), (0, 0), (0, L1 - W * Cin))).astype(jnp.bfloat16)

    B = _pick_batch_block(N)
    grid = (N // B,)

    def kernel(x_ref, w1_ref, b1_ref, w2_ref, b2_ref, w3_ref, b3_ref,
               wfc_ref, bfc_ref, o_ref):

        def vpad(planes):
            # vertical zero padding = 2 constant zero planes on each side
            z = jnp.zeros((PAD,) + planes.shape[1:], planes.dtype)
            return jnp.concatenate([z, planes, z], axis=0)

        def conv(planes, h_out, w_ref_, b_ref_):
            # planes: (h_out + 2*PAD, B, L) bf16.  dy slices are leading-axis
            # plane selections; the lane-aligned concat builds the im2col
            # patches; dx taps / horizontal padding live in the weight.
            L = planes.shape[-1]
            patches = jnp.concatenate(
                [planes[dy:dy + h_out].reshape(h_out * B, L) for dy in range(K)],
                axis=-1)                                            # (h_out*B, K*L)
            acc = jnp.dot(patches, w_ref_[...],
                          preferred_element_type=jnp.float32)       # f32 accumulate
            return jnp.maximum(acc + b_ref_[...], 0.0)              # f32 epilogue

        def pool2x2(y, h_in, group):
            # y: (h_in*B, n_l) f32, rows ordered (h, b), lanes (w, c).
            n_l = y.shape[-1]
            yh = y.reshape(h_in // 2, 2, B, n_l)
            ph = jnp.maximum(yh[:, 0], yh[:, 1]).reshape(h_in // 2 * B, n_l)
            # shift lanes left by one w-group; even-w groups then hold the 2x2
            # max; odd-w groups become don't-care (next layer's Toeplitz weight
            # has zero rows there).
            shifted = jnp.concatenate([ph[:, group:], ph[:, :group]], axis=-1)
            pw = jnp.maximum(ph, shifted)
            return pw.reshape(h_in // 2, B, n_l)

        # layer 1: conv(Cin->16) + ReLU + pool
        y1 = conv(vpad(x_ref[...]), H, w1_ref, b1_ref)               # (H*B, N1)
        p1 = pool2x2(y1, H, C1)                                      # (H2, B, N1)
        # layer 2: conv(16->20) + ReLU + pool
        y2 = conv(vpad(p1.astype(jnp.bfloat16)), H2, w2_ref, b2_ref)  # (H2*B, N2)
        p2 = pool2x2(y2, H2, S2_OUT)                                 # (H3, B, N2)
        # layer 3: conv(20->20) + ReLU
        y3 = conv(vpad(p2.astype(jnp.bfloat16)), H3, w3_ref, b3_ref)  # (H3*B, N3)
        # flatten (folded into wfc) + FC
        y3r = y3.reshape(H3, B, N3)
        flat = jnp.concatenate([y3r[h] for h in range(H3)], axis=-1)  # (B, H3*N3)
        logits = jnp.dot(flat.astype(jnp.bfloat16), wfc_ref[...],
                         preferred_element_type=jnp.float32) + bfc_ref[...]
        o_ref[...] = logits.astype(o_ref.dtype)

    return pl.pallas_call(
        kernel,
        out_shape=jax.ShapeDtypeStruct((N, NCLS), jnp.float32),
        grid_spec=pltpu.PrefetchScalarGridSpec(
            num_scalar_prefetch=0,
            grid=grid,
            in_specs=[
                pl.BlockSpec((H, B, L1), lambda n: (0, n, 0)),
                pl.BlockSpec(w1.shape, lambda n: (0, 0)),
                pl.BlockSpec(b1.shape, lambda n: (0, 0)),
                pl.BlockSpec(w2.shape, lambda n: (0, 0)),
                pl.BlockSpec(b2.shape, lambda n: (0, 0)),
                pl.BlockSpec(w3.shape, lambda n: (0, 0)),
                pl.BlockSpec(b3.shape, lambda n: (0, 0)),
                pl.BlockSpec(wfc.shape, lambda n: (0, 0)),
                pl.BlockSpec(bfc.shape, lambda n: (0, 0)),
            ],
            out_specs=pl.BlockSpec((B, NCLS), lambda n: (n, 0)),
        ),
        compiler_params=pltpu.CompilerParams(
            dimension_semantics=("parallel",),          # batch axis -> megacore
            vmem_limit_bytes=48 * 1024 * 1024,          # safe on v5e/v6e/v7x
        ),
    )(xt, w1, b1, w2, b2, w3, b3, wfc, bfc)


# ----------------------------------------------------------------------------
# Pure-JAX reference (correctness check only).
# ----------------------------------------------------------------------------
def _ref_forward(x_nchw, params):
    def conv(x, w, b):
        y = lax.conv_general_dilated(
            x, w, window_strides=(1, 1), padding=((2, 2), (2, 2)),
            dimension_numbers=("NCHW", "OIHW", "NCHW"))
        return jnp.maximum(y + b.reshape(1, -1, 1, 1), 0.0)

    def pool(x):
        return lax.reduce_window(x, -jnp.inf, lax.max,
                                 (1, 1, 2, 2), (1, 1, 2, 2), "VALID")

    x = pool(conv(x_nchw, params["conv1_w"], params["conv1_b"]))
    x = pool(conv(x, params["conv2_w"], params["conv2_b"]))
    x = conv(x, params["conv3_w"], params["conv3_b"])
    x = x.reshape(x.shape[0], -1)
    return x @ params["fc_w"].T + params["fc_b"]


# ----------------------------------------------------------------------------
# Main
# ----------------------------------------------------------------------------
if __name__ == "__main__":
    # input_size = (C, H, W) = (4, 16, 16); fc in = 16*16//16*20 = 320.
    N, C, H, W = 2, 4, 16, 16

    key = jax.random.PRNGKey(0)
    ks = jax.random.split(key, 9)
    params = {
        "conv1_w": 0.05 * jax.random.normal(ks[0], (16, C, 5, 5), jnp.float32),
        "conv1_b": 0.05 * jax.random.normal(ks[1], (16,), jnp.float32),
        "conv2_w": 0.05 * jax.random.normal(ks[2], (20, 16, 5, 5), jnp.float32),
        "conv2_b": 0.05 * jax.random.normal(ks[3], (20,), jnp.float32),
        "conv3_w": 0.05 * jax.random.normal(ks[4], (20, 20, 5, 5), jnp.float32),
        "conv3_b": 0.05 * jax.random.normal(ks[5], (20,), jnp.float32),
        "fc_w": 0.05 * jax.random.normal(ks[6], (10, H * W // 16 * 20), jnp.float32),
        "fc_b": 0.05 * jax.random.normal(ks[7], (10,), jnp.float32),
    }
    x = jax.random.normal(ks[8], (N, C, H, W), jnp.float32)

    out = jax.jit(proxprop_convnet_forward)(x, params)
    out = jax.block_until_ready(out)

    ref = _ref_forward(x, params)
    assert out.shape == (N, 10), out.shape
    # bf16 MXU operands end-to-end (input, activations, conv + FC weights);
    # accumulation and epilogues are f32 -> loose-ish tolerance.
    err = float(jnp.max(jnp.abs(out - ref)))
    assert err < 4e-2, err

    print("KERNEL_OK")
</pallas_src>

<mosaic_0001>
module attributes {stable_mosaic.version = 11 : i64} {
  func.func @kernel(%arg0: i32, %arg1: memref<16x2x128xbf16, #tpu.memory_space<vmem>>, %arg2: memref<640x256xbf16, #tpu.memory_space<vmem>>, %arg3: memref<1x256xf32, #tpu.memory_space<vmem>>, %arg4: memref<1280x256xbf16, #tpu.memory_space<vmem>>, %arg5: memref<1x256xf32, #tpu.memory_space<vmem>>, %arg6: memref<1280x128xbf16, #tpu.memory_space<vmem>>, %arg7: memref<1x128xf32, #tpu.memory_space<vmem>>, %arg8: memref<512x10xbf16, #tpu.memory_space<vmem>>, %arg9: memref<1x10xf32, #tpu.memory_space<vmem>>, %arg10: memref<2x10xf32, #tpu.memory_space<vmem>>) attributes {dimension_semantics = [#tpu.dimension_semantics<parallel>], iteration_bounds = array<i64: 1>, scalar_prefetch = 0 : i64, scratch_operands = 0 : i64, tpu.core_type = #tpu.core_type<tc>, window_params = [{transform_indices = @transform_0, window_bounds = array<i64: 16, 2, 128>}, {pipeline_mode = #tpu.pipeline_mode<synchronous>, transform_indices = @transform_1, window_bounds = array<i64: 640, 256>}, {pipeline_mode = #tpu.pipeline_mode<synchronous>, transform_indices = @transform_2, window_bounds = array<i64: 1, 256>}, {pipeline_mode = #tpu.pipeline_mode<synchronous>, transform_indices = @transform_3, window_bounds = array<i64: 1280, 256>}, {pipeline_mode = #tpu.pipeline_mode<synchronous>, transform_indices = @transform_4, window_bounds = array<i64: 1, 256>}, {pipeline_mode = #tpu.pipeline_mode<synchronous>, transform_indices = @transform_5, window_bounds = array<i64: 1280, 128>}, {pipeline_mode = #tpu.pipeline_mode<synchronous>, transform_indices = @transform_6, window_bounds = array<i64: 1, 128>}, {pipeline_mode = #tpu.pipeline_mode<synchronous>, transform_indices = @transform_7, window_bounds = array<i64: 512, 10>}, {pipeline_mode = #tpu.pipeline_mode<synchronous>, transform_indices = @transform_8, window_bounds = array<i64: 1, 10>}, {transform_indices = @transform_9, window_bounds = array<i64: 2, 10>}]} {
    %c0 = arith.constant 0 : index
    %c0_0 = arith.constant 0 : index
    %c0_1 = arith.constant 0 : index
    %0 = vector.load %arg1[%c0, %c0_0, %c0_1] : memref<16x2x128xbf16, #tpu.memory_space<vmem>>, vector<16x2x128xbf16>
    %cst = arith.constant 0.000000e+00 : bf16
    %1 = vector.broadcast %cst : bf16 to vector<2x2x128xbf16>
    %2 = tpu.concatenate %1, %0, %1 in 0 : vector<2x2x128xbf16>, vector<16x2x128xbf16>, vector<2x2x128xbf16> -> vector<20x2x128xbf16>
    %3 = vector.extract_strided_slice %2 {offsets = [0, 0, 0], sizes = [16, 2, 128], strides = [1, 1, 1]} : vector<20x2x128xbf16> to vector<16x2x128xbf16>
    %4 = vector.shape_cast %3 : vector<16x2x128xbf16> to vector<32x128xbf16>
    %5 = vector.extract_strided_slice %2 {offsets = [1, 0, 0], sizes = [16, 2, 128], strides = [1, 1, 1]} : vector<20x2x128xbf16> to vector<16x2x128xbf16>
    %6 = vector.shape_cast %5 : vector<16x2x128xbf16> to vector<32x128xbf16>
    %7 = vector.extract_strided_slice %2 {offsets = [2, 0, 0], sizes = [16, 2, 128], strides = [1, 1, 1]} : vector<20x2x128xbf16> to vector<16x2x128xbf16>
    %8 = vector.shape_cast %7 : vector<16x2x128xbf16> to vector<32x128xbf16>
    %9 = vector.extract_strided_slice %2 {offsets = [3, 0, 0], sizes = [16, 2, 128], strides = [1, 1, 1]} : vector<20x2x128xbf16> to vector<16x2x128xbf16>
    %10 = vector.shape_cast %9 : vector<16x2x128xbf16> to vector<32x128xbf16>
    %11 = vector.extract_strided_slice %2 {offsets = [4, 0, 0], sizes = [16, 2, 128], strides = [1, 1, 1]} : vector<20x2x128xbf16> to vector<16x2x128xbf16>
    %12 = vector.shape_cast %11 : vector<16x2x128xbf16> to vector<32x128xbf16>
    %13 = tpu.concatenate %4, %6, %8, %10, %12 in 1 : vector<32x128xbf16>, vector<32x128xbf16>, vector<32x128xbf16>, vector<32x128xbf16>, vector<32x128xbf16> -> vector<32x640xbf16>
    %c0_2 = arith.constant 0 : index
    %c0_3 = arith.constant 0 : index
    %14 = vector.load %arg2[%c0_2, %c0_3] : memref<640x256xbf16, #tpu.memory_space<vmem>>, vector<640x256xbf16>
    %cst_4 = arith.constant dense<0.000000e+00> : vector<32x256xf32>
    %15 = tpu.matmul %13, %14, %cst_4 {dimension_numbers = #tpu.dot_dimension_numbers<[1], [0], [0], [1], [0, 0, 1, 1], [], []>} : vector<32x640xbf16>, vector<640x256xbf16>, vector<32x256xf32> -> vector<32x256xf32>
    %c0_5 = arith.constant 0 : index
    %c0_6 = arith.constant 0 : index
    %16 = vector.load %arg3[%c0_5, %c0_6] : memref<1x256xf32, #tpu.memory_space<vmem>>, vector<1x256xf32>
    %17 = vector.broadcast %16 : vector<1x256xf32> to vector<32x256xf32>
    %18 = arith.addf %15, %17 : vector<32x256xf32>
    %cst_7 = arith.constant 0.000000e+00 : f32
    %19 = vector.broadcast %cst_7 : f32 to vector<32x256xf32>
    %20 = arith.maximumf %18, %19 : vector<32x256xf32>
    %21 = vector.shape_cast %20 : vector<32x256xf32> to vector<8x2x2x256xf32>
    %22 = vector.extract_strided_slice %21 {offsets = [0, 0, 0, 0], sizes = [8, 1, 2, 256], strides = [1, 1, 1, 1]} : vector<8x2x2x256xf32> to vector<8x1x2x256xf32>
    %23 = vector.shape_cast %22 : vector<8x1x2x256xf32> to vector<8x2x256xf32>
    %24 = vector.extract_strided_slice %21 {offsets = [0, 1, 0, 0], sizes = [8, 1, 2, 256], strides = [1, 1, 1, 1]} : vector<8x2x2x256xf32> to vector<8x1x2x256xf32>
    %25 = vector.shape_cast %24 : vector<8x1x2x256xf32> to vector<8x2x256xf32>
    %26 = arith.maximumf %23, %25 : vector<8x2x256xf32>
    %27 = vector.shape_cast %26 : vector<8x2x256xf32> to vector<16x256xf32>
    %28 = vector.extract_strided_slice %27 {offsets = [0, 16], sizes = [16, 240], strides = [1, 1]} : vector<16x256xf32> to vector<16x240xf32>
    %29 = vector.extract_strided_slice %27 {offsets = [0, 0], sizes = [16, 16], strides = [1, 1]} : vector<16x256xf32> to vector<16x16xf32>
    %30 = tpu.concatenate %28, %29 in 1 : vector<16x240xf32>, vector<16x16xf32> -> vector<16x256xf32>
    %31 = arith.maximumf %27, %30 : vector<16x256xf32>
    %32 = vector.shape_cast %31 : vector<16x256xf32> to vector<8x2x256xf32>
    %33 = arith.truncf %32 : vector<8x2x256xf32> to vector<8x2x256xbf16>
    %cst_8 = arith.constant 0.000000e+00 : bf16
    %34 = vector.broadcast %cst_8 : bf16 to vector<2x2x256xbf16>
    %35 = tpu.concatenate %34, %33, %34 in 0 : vector<2x2x256xbf16>, vector<8x2x256xbf16>, vector<2x2x256xbf16> -> vector<12x2x256xbf16>
    %36 = vector.extract_strided_slice %35 {offsets = [0, 0, 0], sizes = [8, 2, 256], strides = [1, 1, 1]} : vector<12x2x256xbf16> to vector<8x2x256xbf16>
    %37 = vector.shape_cast %36 : vector<8x2x256xbf16> to vector<16x256xbf16>
    %38 = vector.extract_strided_slice %35 {offsets = [1, 0, 0], sizes = [8, 2, 256], strides = [1, 1, 1]} : vector<12x2x256xbf16> to vector<8x2x256xbf16>
    %39 = vector.shape_cast %38 : vector<8x2x256xbf16> to vector<16x256xbf16>
    %40 = vector.extract_strided_slice %35 {offsets = [2, 0, 0], sizes = [8, 2, 256], strides = [1, 1, 1]} : vector<12x2x256xbf16> to vector<8x2x256xbf16>
    %41 = vector.shape_cast %40 : vector<8x2x256xbf16> to vector<16x256xbf16>
    %42 = vector.extract_strided_slice %35 {offsets = [3, 0, 0], sizes = [8, 2, 256], strides = [1, 1, 1]} : vector<12x2x256xbf16> to vector<8x2x256xbf16>
    %43 = vector.shape_cast %42 : vector<8x2x256xbf16> to vector<16x256xbf16>
    %44 = vector.extract_strided_slice %35 {offsets = [4, 0, 0], sizes = [8, 2, 256], strides = [1, 1, 1]} : vector<12x2x256xbf16> to vector<8x2x256xbf16>
    %45 = vector.shape_cast %44 : vector<8x2x256xbf16> to vector<16x256xbf16>
    %46 = tpu.concatenate %37, %39, %41, %43, %45 in 1 : vector<16x256xbf16>, vector<16x256xbf16>, vector<16x256xbf16>, vector<16x256xbf16>, vector<16x256xbf16> -> vector<16x1280xbf16>
    %c0_9 = arith.constant 0 : index
    %c0_10 = arith.constant 0 : index
    %47 = vector.load %arg4[%c0_9, %c0_10] : memref<1280x256xbf16, #tpu.memory_space<vmem>>, vector<1280x256xbf16>
    %cst_11 = arith.constant dense<0.000000e+00> : vector<16x256xf32>
    %48 = tpu.matmul %46, %47, %cst_11 {dimension_numbers = #tpu.dot_dimension_numbers<[1], [0], [0], [1], [0, 0, 1, 1], [], []>} : vector<16x1280xbf16>, vector<1280x256xbf16>, vector<16x256xf32> -> vector<16x256xf32>
    %c0_12 = arith.constant 0 : index
    %c0_13 = arith.constant 0 : index
    %49 = vector.load %arg5[%c0_12, %c0_13] : memref<1x256xf32, #tpu.memory_space<vmem>>, vector<1x256xf32>
    %50 = vector.broadcast %49 : vector<1x256xf32> to vector<16x256xf32>
    %51 = arith.addf %48, %50 : vector<16x256xf32>
    %cst_14 = arith.constant 0.000000e+00 : f32
    %52 = vector.broadcast %cst_14 : f32 to vector<16x256xf32>
    %53 = arith.maximumf %51, %52 : vector<16x256xf32>
    %54 = vector.shape_cast %53 : vector<16x256xf32> to vector<4x2x2x256xf32>
    %55 = vector.extract_strided_slice %54 {offsets = [0, 0, 0, 0], sizes = [4, 1, 2, 256], strides = [1, 1, 1, 1]} : vector<4x2x2x256xf32> to vector<4x1x2x256xf32>
    %56 = vector.shape_cast %55 : vector<4x1x2x256xf32> to vector<4x2x256xf32>
    %57 = vector.extract_strided_slice %54 {offsets = [0, 1, 0, 0], sizes = [4, 1, 2, 256], strides = [1, 1, 1, 1]} : vector<4x2x2x256xf32> to vector<4x1x2x256xf32>
    %58 = vector.shape_cast %57 : vector<4x1x2x256xf32> to vector<4x2x256xf32>
    %59 = arith.maximumf %56, %58 : vector<4x2x256xf32>
    %60 = vector.shape_cast %59 : vector<4x2x256xf32> to vector<8x256xf32>
    %61 = vector.extract_strided_slice %60 {offsets = [0, 32], sizes = [8, 224], strides = [1, 1]} : vector<8x256xf32> to vector<8x224xf32>
    %62 = vector.extract_strided_slice %60 {offsets = [0, 0], sizes = [8, 32], strides = [1, 1]} : vector<8x256xf32> to vector<8x32xf32>
    %63 = tpu.concatenate %61, %62 in 1 : vector<8x224xf32>, vector<8x32xf32> -> vector<8x256xf32>
    %64 = arith.maximumf %60, %63 : vector<8x256xf32>
    %65 = vector.shape_cast %64 : vector<8x256xf32> to vector<4x2x256xf32>
    %66 = arith.truncf %65 : vector<4x2x256xf32> to vector<4x2x256xbf16>
    %cst_15 = arith.constant 0.000000e+00 : bf16
    %67 = vector.broadcast %cst_15 : bf16 to vector<2x2x256xbf16>
    %68 = tpu.concatenate %67, %66, %67 in 0 : vector<2x2x256xbf16>, vector<4x2x256xbf16>, vector<2x2x256xbf16> -> vector<8x2x256xbf16>
    %69 = vector.extract_strided_slice %68 {offsets = [0, 0, 0], sizes = [4, 2, 256], strides = [1, 1, 1]} : vector<8x2x256xbf16> to vector<4x2x256xbf16>
    %70 = vector.shape_cast %69 : vector<4x2x256xbf16> to vector<8x256xbf16>
    %71 = vector.extract_strided_slice %68 {offsets = [1, 0, 0], sizes = [4, 2, 256], strides = [1, 1, 1]} : vector<8x2x256xbf16> to vector<4x2x256xbf16>
    %72 = vector.shape_cast %71 : vector<4x2x256xbf16> to vector<8x256xbf16>
    %73 = vector.extract_strided_slice %68 {offsets = [2, 0, 0], sizes = [4, 2, 256], strides = [1, 1, 1]} : vector<8x2x256xbf16> to vector<4x2x256xbf16>
    %74 = vector.shape_cast %73 : vector<4x2x256xbf16> to vector<8x256xbf16>
    %75 = vector.extract_strided_slice %68 {offsets = [3, 0, 0], sizes = [4, 2, 256], strides = [1, 1, 1]} : vector<8x2x256xbf16> to vector<4x2x256xbf16>
    %76 = vector.shape_cast %75 : vector<4x2x256xbf16> to vector<8x256xbf16>
    %77 = vector.extract_strided_slice %68 {offsets = [4, 0, 0], sizes = [4, 2, 256], strides = [1, 1, 1]} : vector<8x2x256xbf16> to vector<4x2x256xbf16>
    %78 = vector.shape_cast %77 : vector<4x2x256xbf16> to vector<8x256xbf16>
    %79 = tpu.concatenate %70, %72, %74, %76, %78 in 1 : vector<8x256xbf16>, vector<8x256xbf16>, vector<8x256xbf16>, vector<8x256xbf16>, vector<8x256xbf16> -> vector<8x1280xbf16>
    %c0_16 = arith.constant 0 : index
    %c0_17 = arith.constant 0 : index
    %80 = vector.load %arg6[%c0_16, %c0_17] : memref<1280x128xbf16, #tpu.memory_space<vmem>>, vector<1280x128xbf16>
    %cst_18 = arith.constant dense<0.000000e+00> : vector<8x128xf32>
    %81 = tpu.matmul %79, %80, %cst_18 {dimension_numbers = #tpu.dot_dimension_numbers<[1], [0], [0], [1], [0, 0, 1, 1], [], []>} : vector<8x1280xbf16>, vector<1280x128xbf16>, vector<8x128xf32> -> vector<8x128xf32>
    %c0_19 = arith.constant 0 : index
    %c0_20 = arith.constant 0 : index
    %82 = vector.load %arg7[%c0_19, %c0_20] : memref<1x128xf32, #tpu.memory_space<vmem>>, vector<1x128xf32>
    %83 = vector.broadcast %82 : vector<1x128xf32> to vector<8x128xf32>
    %84 = arith.addf %81, %83 : vector<8x128xf32>
    %cst_21 = arith.constant 0.000000e+00 : f32
    %85 = vector.broadcast %cst_21 : f32 to vector<8x128xf32>
    %86 = arith.maximumf %84, %85 : vector<8x128xf32>
    %87 = vector.shape_cast %86 : vector<8x128xf32> to vector<4x2x128xf32>
    %88 = vector.extract_strided_slice %87 {offsets = [0, 0, 0], sizes = [1, 2, 128], strides = [1, 1, 1]} : vector<4x2x128xf32> to vector<1x2x128xf32>
    %89 = vector.shape_cast %88 : vector<1x2x128xf32> to vector<2x128xf32>
    %90 = vector.extract_strided_slice %87 {offsets = [1, 0, 0], sizes = [1, 2, 128], strides = [1, 1, 1]} : vector<4x2x128xf32> to vector<1x2x128xf32>
    %91 = vector.shape_cast %90 : vector<1x2x128xf32> to vector<2x128xf32>
    %92 = vector.extract_strided_slice %87 {offsets = [2, 0, 0], sizes = [1, 2, 128], strides = [1, 1, 1]} : vector<4x2x128xf32> to vector<1x2x128xf32>
    %93 = vector.shape_cast %92 : vector<1x2x128xf32> to vector<2x128xf32>
    %94 = vector.extract_strided_slice %87 {offsets = [3, 0, 0], sizes = [1, 2, 128], strides = [1, 1, 1]} : vector<4x2x128xf32> to vector<1x2x128xf32>
    %95 = vector.shape_cast %94 : vector<1x2x128xf32> to vector<2x128xf32>
    %96 = tpu.concatenate %89, %91, %93, %95 in 1 : vector<2x128xf32>, vector<2x128xf32>, vector<2x128xf32>, vector<2x128xf32> -> vector<2x512xf32>
    %97 = arith.truncf %96 : vector<2x512xf32> to vector<2x512xbf16>
    %c0_22 = arith.constant 0 : index
    %c0_23 = arith.constant 0 : index
    %98 = vector.load %arg8[%c0_22, %c0_23] : memref<512x10xbf16, #tpu.memory_space<vmem>>, vector<512x10xbf16>
    %cst_24 = arith.constant dense<0.000000e+00> : vector<2x10xf32>
    %99 = tpu.matmul %97, %98, %cst_24 {dimension_numbers = #tpu.dot_dimension_numbers<[1], [0], [0], [1], [0, 0, 1, 1], [], []>} : vector<2x512xbf16>, vector<512x10xbf16>, vector<2x10xf32> -> vector<2x10xf32>
    %c0_25 = arith.constant 0 : index
    %c0_26 = arith.constant 0 : index
    %100 = vector.load %arg9[%c0_25, %c0_26] : memref<1x10xf32, #tpu.memory_space<vmem>>, vector<1x10xf32>
    %101 = vector.broadcast %100 : vector<1x10xf32> to vector<2x10xf32>
    %102 = arith.addf %99, %101 : vector<2x10xf32>
    %c0_27 = arith.constant 0 : index
    %c0_28 = arith.constant 0 : index
    %103 = vector.load %arg10[%c0_27, %c0_28] : memref<2x10xf32, #tpu.memory_space<vmem>>, vector<2x10xf32>
    tpu.vector_store %arg10[%c0_27, %c0_28], %102 {strides = array<i32>} : memref<2x10xf32, #tpu.memory_space<vmem>>, vector<2x10xf32>,
    return
  }
  func.func @transform_0(%arg0: i32) -> (i32, i32, i32) {
    %c0_i32 = arith.constant 0 : i32
    %c0_i32_0 = arith.constant 0 : i32
    %c0_i32_1 = arith.constant 0 : i32
    return %c0_i32, %arg0, %c0_i32_0 : i32, i32, i32
  }
  func.func @transform_1(%arg0: i32) -> (i32, i32) {
    %c0_i32 = arith.constant 0 : i32
    %c0_i32_0 = arith.constant 0 : i32
    %c0_i32_1 = arith.constant 0 : i32
    return %c0_i32, %c0_i32_0 : i32, i32
  }
  func.func @transform_2(%arg0: i32) -> (i32, i32) {
    %c0_i32 = arith.constant 0 : i32
    %c0_i32_0 = arith.constant 0 : i32
    %c0_i32_1 = arith.constant 0 : i32
    return %c0_i32, %c0_i32_0 : i32, i32
  }
  func.func @transform_3(%arg0: i32) -> (i32, i32) {
    %c0_i32 = arith.constant 0 : i32
    %c0_i32_0 = arith.constant 0 : i32
    %c0_i32_1 = arith.constant 0 : i32
    return %c0_i32, %c0_i32_0 : i32, i32
  }
  func.func @transform_4(%arg0: i32) -> (i32, i32) {
    %c0_i32 = arith.constant 0 : i32
    %c0_i32_0 = arith.constant 0 : i32
    %c0_i32_1 = arith.constant 0 : i32
    return %c0_i32, %c0_i32_0 : i32, i32
  }
  func.func @transform_5(%arg0: i32) -> (i32, i32) {
    %c0_i32 = arith.constant 0 : i32
    %c0_i32_0 = arith.constant 0 : i32
    %c0_i32_1 = arith.constant 0 : i32
    return %c0_i32, %c0_i32_0 : i32, i32
  }
  func.func @transform_6(%arg0: i32) -> (i32, i32) {
    %c0_i32 = arith.constant 0 : i32
    %c0_i32_0 = arith.constant 0 : i32
    %c0_i32_1 = arith.constant 0 : i32
    return %c0_i32, %c0_i32_0 : i32, i32
  }
  func.func @transform_7(%arg0: i32) -> (i32, i32) {
    %c0_i32 = arith.constant 0 : i32
    %c0_i32_0 = arith.constant 0 : i32
    %c0_i32_1 = arith.constant 0 : i32
    return %c0_i32, %c0_i32_0 : i32, i32
  }
  func.func @transform_8(%arg0: i32) -> (i32, i32) {
    %c0_i32 = arith.constant 0 : i32
    %c0_i32_0 = arith.constant 0 : i32
    %c0_i32_1 = arith.constant 0 : i32
    return %c0_i32, %c0_i32_0 : i32, i32
  }
  func.func @transform_9(%arg0: i32) -> (i32, i32) {
    %c0_i32 = arith.constant 0 : i32
    %c0_i32_0 = arith.constant 0 : i32
    return %arg0, %c0_i32 : i32, i32
  }
}

</mosaic_0001>

<bundles_post_ra>
// kernel: tile.18
= control target key start
LH: loop header
LB: loop body
LE: loop exit
PB: predicated region body
PF: predicated region fallthrough
CT: control target
= control target key end

     0   :  { %s28_s0 = inlined_call_operand.vmem [shape: f32[16], index: 0, kind: input, shape index: {}]   ;;  %s29_s1 = inlined_call_operand.vmem [shape: f32[16,16], index: 1, kind: output, shape index: {}]  }
   0x1   :  { %v4_v0 = vld [vmem:[%s28_s0] ss:$0 sm:$0xff] }
   0x2   :  { %5 = vst [vmem:[%s29_s1] sm:$0xff] %v4_v0  ;;  %8 = vst [vmem:[%s29_s1 + $0x8] sm:$0xff] %v4_v0 }

// kernel: tile.19
= control target key start
LH: loop header
LB: loop body
LE: loop exit
PB: predicated region body
PF: predicated region fallthrough
CT: control target
= control target key end

     0   :  { %s7_s6 = smov 3  ;;  %s21_s9 = smov 3  ;;  %vm4_vm0 = vcmask 130048   ;;  %vm11_vm1 = vcmask 1048448   ;;  %vm18_vm2 = vcmask 917248   ;;  %vm25_vm3 = vcmask 786048   ;;  %s128_s0 = inlined_call_operand.vmem [shape: f32[16,16], index: 0, kind: input, shape index: {}]   ;;  %s129_s1 = inlined_call_operand.vmem [shape: f32[1,256], index: 1, kind: output, shape index: {}]  }
   0x1   :  { %v66_v0 = vld [vmem:[%s128_s0 + $0x7] ss:$8 sm:%s7_s6]   ;;  %s81_s10 = smov 112   ;;  %v68_v1 = vld [vmem:[%s128_s0 + $0x5] ss:$8 sm:%s21_s9]   ;;  %s14_s13 = smov 3 }
   0x2   :  { %9 = vrot.lane.b32.xlu0 %v66_v0, %s81_s10  ;;  %s82_s14 = smov 80   ;;  %v67_v2 = vld [vmem:[%s128_s0 + $0x6] ss:$8 sm:%s14_s13]   ;;  %s28_s17 = smov 3  ;;  %vm32_vm4 = vcmask 654848   ;;  %vm39_vm5 = vcmask 523648  }
   0x3   :  { %23 = vrot.lane.b32.xlu1 %v68_v1, %s82_s14  ;;  %v69_v3 = vld [vmem:[%s128_s0 + $0x4] ss:$8 sm:%s28_s17]   ;;  %s35_s20 = smov 3  ;;  %s42_s21 = smov 3  ;;  %vm46_vm6 = vcmask 392448   ;;  %vm53_vm7 = vcmask 261248  }
   0x4   :  { %s83_s22 = smov 96   ;;  %s84_s23 = smov 64   ;;  %v70_v4 = vld [vmem:[%s128_s0 + $0x3] ss:$8 sm:%s35_s20]   ;;  %v71_v5 = vld [vmem:[%s128_s0 + $0x2] ss:$8 sm:%s42_s21]  }
   0x5   :  { %s2_s26 = smov 3  ;;  %s49_s29 = smov 3 }
   0x6   :  { %16 = vrot.lane.b32.xlu0 %v67_v2, %s83_s22  ;;  %v3_v6 = vld [vmem:[%s128_s0] ss:$8 sm:%s2_s26]   ;;  %s85_s3 = smov 48   ;;  %s86_s4 = smov 32  }
   0x7   :  { %30 = vrot.lane.b32.xlu1 %v69_v3, %s84_s23  ;;  %5 = vst.msk [vmem:[#allocation0] ss:$8 sm:$0x3] %vm4_vm0, %v3_v6   ;;  %v72_v7 = vld [vmem:[%s128_s0 + $0x1] ss:$8 sm:%s49_s29]   ;;  %s87_s0 = smov 16  }
   0xa   :  { %37 = vrot.lane.b32.xlu0 %v70_v4, %s85_s3 }
   0xb   :  { %44 = vrot.lane.b32.xlu1 %v71_v5, %s86_s4 }
   0xe   :  { %51 = vrot.lane.b32.xlu0 %v72_v7, %s87_s0 }
  0x74   :  { %v10_v8 = vpop.permute.xlu0 %9  }
  0x75   :  { %12 = vst.msk [vmem:[#allocation0] ss:$8 sm:$0x3] %vm11_vm1, %v10_v8   ;;  %v24_v9 = vpop.permute.xlu1 %23  }
  0x78   :  { %v17_v10 = vpop.permute.xlu0 %16  }
  0x79   :  { %19 = vst.msk [vmem:[#allocation0] ss:$8 sm:$0x3] %vm18_vm2, %v17_v10   ;;  %v31_v11 = vpop.permute.xlu1 %30  }
  0x7a   :  { %26 = vst.msk [vmem:[#allocation0] ss:$8 sm:$0x3] %vm25_vm3, %v24_v9  }
  0x7b   :  { %33 = vst.msk [vmem:[#allocation0] ss:$8 sm:$0x3] %vm32_vm4, %v31_v11  }
  0x7c   :  { %v38_v12 = vpop.permute.xlu0 %37  }
  0x7d   :  { %40 = vst.msk [vmem:[#allocation0] ss:$8 sm:$0x3] %vm39_vm5, %v38_v12   ;;  %v45_v13 = vpop.permute.xlu1 %44  }
  0x7e   :  { %47 = vst.msk [vmem:[#allocation0] ss:$8 sm:$0x3] %vm46_vm6, %v45_v13  }
  0x80   :  { %v52_v14 = vpop.permute.xlu0 %51  }
  0x81   :  { %54 = vst.msk [vmem:[#allocation0] ss:$8 sm:$0x3] %vm53_vm7, %v52_v14  }
  0x88   :  { %v58_v15 = vld [vmem:[#allocation0] sm:$0x1]  ;;  %v62_v16 = vld [vmem:[#allocation0 + $0x8] sm:$0x1] }
  0x89   :  { %60 = vst [vmem:[%s129_s1] sm:$0x1] %v58_v15  ;;  %73 = vst [vmem:[%s129_s1 + $0x1] sm:$0x1] %v62_v16 }

// kernel: tile.23
= control target key start
LH: loop header
LB: loop body
LE: loop exit
PB: predicated region body
PF: predicated region fallthrough
CT: control target
= control target key end

     0   :  { %s22_s0 = inlined_call_operand.vmem [shape: f32[32], index: 0, kind: input, shape index: {}]   ;;  %s23_s1 = inlined_call_operand.vmem [shape: f32[8,32], index: 1, kind: output, shape index: {}]  }
   0x1   :  { %v4_v0 = vld [vmem:[%s22_s0] ss:$0 sm:$0xff] }
   0x2   :  { %5 = vst [vmem:[%s23_s1] sm:$0xff] %v4_v0 }

// kernel: tile.28
= control target key start
LH: loop header
LB: loop body
LE: loop exit
PB: predicated region body
PF: predicated region fallthrough
CT: control target
= control target key end

     0   :  { %s22_s0 = inlined_call_operand.vmem [shape: f32[32], index: 0, kind: input, shape index: {}]   ;;  %s23_s1 = inlined_call_operand.vmem [shape: f32[4,32], index: 1, kind: output, shape index: {}]  }
   0x1   :  { %v4_v0 = vld [vmem:[%s22_s0] ss:$0 sm:$0xff] }
   0x2   :  { %5 = vst [vmem:[%s23_s1] sm:$0xf] %v4_v0 }

// kernel: tile.24
= control target key start
LH: loop header
LB: loop body
LE: loop exit
PB: predicated region body
PF: predicated region fallthrough
CT: control target
= control target key end

     0   :  { %s7_s6 = smov 3  ;;  %s14_s9 = smov 3  ;;  %vm4_vm0 = vcmask 261120   ;;  %vm11_vm1 = vcmask 1048320   ;;  %vm18_vm2 = vcmask 785920   ;;  %vm25_vm3 = vcmask 523520   ;;  %s76_s0 = inlined_call_operand.vmem [shape: f32[8,32], index: 0, kind: input, shape index: {}]   ;;  %s77_s1 = inlined_call_operand.vmem [shape: f32[1,256], index: 1, kind: output, shape index: {}]  }
   0x1   :  { %v38_v0 = vld [vmem:[%s76_s0 + $0x3] ss:$4 sm:%s7_s6]   ;;  %s45_s10 = smov 96   ;;  %s21_s11 = smov 3  ;;  %v39_v1 = vld [vmem:[%s76_s0 + $0x2] ss:$4 sm:%s14_s9]  }
   0x2   :  { %9 = vrot.lane.b32.xlu0 %v38_v0, %s45_s10  ;;  %v40_v2 = vld [vmem:[%s76_s0 + $0x1] ss:$4 sm:%s21_s11]   ;;  %s2_s16 = smov 3  ;;  %s46_s17 = smov 32  }
   0x3   :  { %23 = vrot.lane.b32.xlu1 %v40_v2, %s46_s17  ;;  %v3_v3 = vld [vmem:[%s76_s0] ss:$4 sm:%s2_s16]   ;;  %s47_s0 = smov 64  }
   0x4   :  { %5 = vst.msk [vmem:[#allocation0] ss:$8 sm:$0x3] %vm4_vm0, %v3_v3  }
   0x6   :  { %16 = vrot.lane.b32.xlu0 %v39_v1, %s47_s0 }
  0x74   :  { %v10_v4 = vpop.permute.xlu0 %9  }
  0x75   :  { %12 = vst.msk [vmem:[#allocation0] ss:$8 sm:$0x3] %vm11_vm1, %v10_v4   ;;  %v24_v5 = vpop.permute.xlu1 %23  }
  0x78   :  { %v17_v6 = vpop.permute.xlu0 %16  }
  0x79   :  { %19 = vst.msk [vmem:[#allocation0] ss:$8 sm:$0x3] %vm18_vm2, %v17_v6  }
  0x7a   :  { %26 = vst.msk [vmem:[#allocation0] ss:$8 sm:$0x3] %vm25_vm3, %v24_v5  }
  0x81   :  { %v30_v7 = vld [vmem:[#allocation0] sm:$0x1]  ;;  %v34_v8 = vld [vmem:[#allocation0 + $0x8] sm:$0x1] }
  0x82   :  { %32 = vst [vmem:[%s77_s1] sm:$0x1] %v30_v7  ;;  %41 = vst [vmem:[%s77_s1 + $0x1] sm:$0x1] %v34_v8 }

// kernel: tile.29
= control target key start
LH: loop header
LB: loop body
LE: loop exit
PB: predicated region body
PF: predicated region fallthrough
CT: control target
= control target key end

     0   :  { %vm7_vm0 = vcmask 261120   ;;  %s37_s8 = smov 32   ;;  %s38_s9 = smov 64   ;;  %vm13_vm1 = vcmask 1048320   ;;  %vm19_vm2 = vcmask 785920   ;;  %vm25_vm3 = vcmask 523520   ;;  %s55_s0 = inlined_call_operand.vmem [shape: f32[4,32], index: 0, kind: input, shape index: {}]   ;;  %s56_s1 = inlined_call_operand.vmem [shape: f32[1,128], index: 1, kind: output, shape index: {}]  }
   0x1   :  { %v4_v0 = vld [vmem:[%s55_s0] sm:$0xf]  ;;  %s36_s0 = smov 96  }
   0x2   :  { %5 = vst [vmem:[#allocation1] sm:$0xf] %v4_v0 }
   0x9   :  { %v10_v1 = vld [vmem:[#allocation1 + $0x3] sm:$0x1]   ;;  %v22_v2 = vld [vmem:[#allocation1 + $0x1] sm:$0x1]   ;;  %v6_v3 = vld [vmem:[#allocation1] sm:$0x1]  }
   0xa   :  { %11 = vrot.lane.b32.xlu0 %v10_v1, %s36_s0  ;;  %23 = vrot.lane.b32.xlu1 %v22_v2, %s37_s8  ;;  %v16_v4 = vld [vmem:[#allocation1 + $0x2] sm:$0x1]   ;;  %8 = vst.msk [vmem:[#allocation0] sm:$0x1] %vm7_vm0, %v6_v3  }
   0xe   :  { %17 = vrot.lane.b32.xlu0 %v16_v4, %s38_s9 }
  0x7c   :  { %v12_v5 = vpop.permute.xlu0 %11   ;;  %v24_v6 = vpop.permute.xlu1 %23  }
  0x7d   :  { %14 = vst.msk [vmem:[#allocation0] sm:$0x1] %vm13_vm1, %v12_v5  }
  0x80   :  { %v18_v7 = vpop.permute.xlu0 %17  }
  0x81   :  { %20 = vst.msk [vmem:[#allocation0] sm:$0x1] %vm19_vm2, %v18_v7  }
  0x82   :  { %26 = vst.msk [vmem:[#allocation0] sm:$0x1] %vm25_vm3, %v24_v6  }
  0x89   :  { %v30_v8 = vld [vmem:[#allocation0] sm:$0x1] }
  0x8a   :  { %32 = vst [vmem:[%s56_s1] sm:$0x1] %v30_v8 }

// kernel: proxprop_convnet_forward.1
= control target key start
LH: loop header
LB: loop body
LE: loop exit
PB: predicated region body
PF: predicated region fallthrough
CT: control target
= control target key end

     0   :  { %v5586_v9 = vmov 1966171168   ;;  %v72_v11 = vlaneseq  ;;  %v5587_v26 = vmov 0   ;;  %s7153_s0 = inlined_call_operand.vmem [shape: bf16[16,2,128], index: 0, kind: input, shape index: {}]   ;;  %s7154_s1 = inlined_call_operand.vmem [shape: bf16[640,256], index: 1, kind: input, shape index: {}]   ;;  %s7155_s2 = inlined_call_operand.vmem [shape: f32[1,256], index: 2, kind: input, shape index: {}]   ;;  %s7156_s3 = inlined_call_operand.vmem [shape: bf16[1280,256], index: 3, kind: input, shape index: {}]   ;;  %s7157_s4 = inlined_call_operand.vmem [shape: f32[1,256], index: 4, kind: input, shape index: {}]   ;;  %s7158_s5 = inlined_call_operand.vmem [shape: bf16[1280,128], index: 5, kind: input, shape index: {}]   ;;  %s7159_s6 = inlined_call_operand.vmem [shape: f32[1,128], index: 6, kind: input, shape index: {}]   ;;  %s7160_s7 = inlined_call_operand.vmem [shape: bf16[512,10], index: 7, kind: input, shape index: {}]   ;;  %s7161_s8 = inlined_call_operand.vmem [shape: f32[1,10], index: 8, kind: input, shape index: {}]   ;;  %s7162_s9 = inlined_call_operand.hbm [shape: f32[2,10], index: 9, kind: output, shape index: {}]  }
   0x1   :  { %v5090_v0 = vld [vmem:[%s7154_s1 + $0x4] ss:$8 sps:$4 sm:$0xff]   ;;  %v5092_v1 = vld [vmem:[%s7154_s1] ss:$8 sps:$4 sm:$0xff]   ;;  %v5093_v2 = vld [vmem:[%s7154_s1 + $0x14] ss:$8 sps:$4 sm:$0xff]   ;;  %v70_v10 = vunpack.c.l.s4 %v5586_v9 }
   0x2   :  { %859 = vmatprep.subr.bf16.mxu0 %v5090_v0  ;;  %v5095_v3 = vld [vmem:[%s7154_s1 + $0x10] ss:$8 sps:$4 sm:$0xff]   ;;  %v5096_v4 = vld [vmem:[%s7154_s1 + $0x24] ss:$8 sps:$4 sm:$0xff]   ;;  %v5098_v5 = vld [vmem:[%s7154_s1 + $0x20] ss:$8 sps:$4 sm:$0xff]  }
   0x3   :  { %860 = vmatpush1.bf16.msra.mxu0 %v5092_v1  ;;  %v5099_v6 = vld [vmem:[%s7154_s1 + $0x34] ss:$8 sps:$4 sm:$0xff]   ;;  %v5101_v7 = vld [vmem:[%s7154_s1 + $0x30] ss:$8 sps:$4 sm:$0xff]   ;;  %v5102_v8 = vld [vmem:[%s7154_s1 + $0x44] ss:$8 sps:$4 sm:$0xff]   ;;  %v71_v14 = vunpack.c.0.s8 %v70_v10 }
   0x4   :  { %861 = vmatprep.subr.bf16.mxu0 %v5093_v2  ;;  %v5104_v12 = vld [vmem:[%s7154_s1 + $0x40] ss:$8 sps:$4 sm:$0xff]   ;;  %v5105_v13 = vld [vmem:[%s7154_s1 + $0x54] ss:$8 sps:$4 sm:$0xff]   ;;  %v5675_v15 = vshrl.u32 %v72_v11, 7 }
   0x5   :  { %v5107_v16 = vld [vmem:[%s7154_s1 + $0x50] ss:$8 sps:$4 sm:$0xff]   ;;  %v5108_v17 = vld [vmem:[%s7154_s1 + $0x64] ss:$8 sps:$4 sm:$0xff]   ;;  %v5110_v19 = vld [vmem:[%s7154_s1 + $0x60] ss:$8 sps:$4 sm:$0xff]  }
   0x6   :  { %v5684_v18 = vsub.s32 %v71_v14, %v5675_v15  ;;  %v34_v20 = vld [vmem:[%s7153_s0] sm:$0x1]  ;;  %v35_v21 = vld [vmem:[%s7153_s0 + $0x1] sm:$0x1]  ;;  %v36_v22 = vld [vmem:[%s7153_s0 + $0x2] sm:$0x1] }
   0x7   :  { %862 = vmatpush1.bf16.msra.mxu0 %v5095_v3  ;;  %v37_v23 = vld [vmem:[%s7153_s0 + $0x3] sm:$0x1]  ;;  %v38_v24 = vld [vmem:[%s7153_s0 + $0x4] sm:$0x1]  ;;  %v66_v25 = vcombine.low %v34_v20, %v35_v21  ;;  %v166_v27 = vcombine.low %v5587_v26, %v34_v20  ;;  %v39_v28 = vld [vmem:[%s7153_s0 + $0x5] sm:$0x1]  ;;  %v167_v32 = vcombine.low %v35_v21, %v36_v22 }
   0x8   :  { %863 = vmatprep.subr.bf16.mxu0 %v5096_v4  ;;  %v40_v29 = vld [vmem:[%s7153_s0 + $0x6] sm:$0x1]  ;;  %v5714_v30 = vld [vmem:[%s7153_s0 + $0x7] sm:$0x1]  ;;  %v67_v31 = vcombine.low %v36_v22, %v37_v23  ;;  %v168_v33 = vcombine.low %v37_v23, %v38_v24  ;;  %v5111_v34 = vld [vmem:[%s7154_s1 + $0x74] ss:$8 sps:$4 sm:$0xff]   ;;  %v68_v35 = vcombine.low %v38_v24, %v39_v28 }
   0x9   :  { %v114_v36 = vcombine.low %v40_v29, %v5714_v30  ;;  %v169_v37 = vcombine.low %v39_v28, %v40_v29  ;;  %v176_v38 = vrot.slane %v166_v27, %v5684_v18  ;;  %v5722_v39 = vrot.slane %v167_v32, %v5684_v18  ;;  %v5113_v46 = vld [vmem:[%s7154_s1 + $0x70] ss:$8 sps:$4 sm:$0xff]   ;;  %v5114_v49 = vld [vmem:[%s7154_s1 + $0x84] ss:$8 sps:$4 sm:$0xff]   ;;  %v5116_v56 = vld [vmem:[%s7154_s1 + $0x80] ss:$8 sps:$4 sm:$0xff]  }
   0xa   :  { %v5725_v40 = vrot.slane %v168_v33, %v5684_v18  ;;  %v5728_v41 = vrot.slane %v66_v25, %v5684_v18  ;;  %v5731_v42 = vrot.slane %v67_v31, %v5684_v18  ;;  %v96_v44 = vrot.slane %v68_v35, %v5684_v18  ;;  %v5117_v57 = vld [vmem:[%s7154_s1 + $0x94] ss:$8 sps:$4 sm:$0xff]   ;;  %v5119_v60 = vld [vmem:[%s7154_s1 + $0x90] ss:$8 sps:$4 sm:$0xff]   ;;  %v5120_v61 = vld [vmem:[%s7154_s1 + $0xa4] ss:$8 sps:$4 sm:$0xff]  }
   0xb   :  { %864 = vmatpush1.bf16.msra.mxu0 %v5098_v5  ;;  %v5734_v43 = vrot.slane %v169_v37, %v5684_v18  ;;  %v124_v45 = vrot.slane %v114_v36, %v5684_v18  ;;  %v198_v47 = vcombine.low %v176_v38, %v5722_v39  ;;  %v5122_v62 = vld [vmem:[%s7154_s1 + $0xa0] ss:$8 sps:$4 sm:$0xff]   ;;  %v5123_v63 = vld [vmem:[%s7154_s1 + $0xb4] ss:$8 sps:$4 sm:$0xff]   ;;  %v5125_v0 = vld [vmem:[%s7154_s1 + $0xb0] ss:$8 sps:$4 sm:$0xff]  }
   0xc   :  { %865 = vmatprep.subr.bf16.mxu0 %v5099_v6  ;;  %v267_v48 = vcombine.low %v5728_v41, %v5731_v42  ;;  %v5126_v1 = vld [vmem:[%s7154_s1 + $0xc4] ss:$8 sps:$4 sm:$0xff]   ;;  %v42_v2 = vld [vmem:[%s7153_s0 + $0x8] sm:$0x1]  ;;  %v43_v3 = vld [vmem:[%s7153_s0 + $0x9] sm:$0x1]  ;;  %v98_v14 = vcombine.low %v5731_v42, %v96_v44 }
   0xd   :  { %v199_v50 = vcombine.low %v5725_v40, %v5734_v43  ;;  %v268_v51 = vcombine.low %v96_v44, %v124_v45  ;;  %v206_v52 = vrot.slane %v198_v47, %v5684_v18  ;;  %v44_v4 = vld [vmem:[%s7153_s0 + $0xa] sm:$0x1]  ;;  %v45_v5 = vld [vmem:[%s7153_s0 + $0xb] sm:$0x1]  ;;  %v46_v6 = vld [vmem:[%s7153_s0 + $0xc] sm:$0x1]  ;;  %v115_v10 = vcombine.low %v42_v2, %v43_v3 }
   0xe   :  { %v5751_v53 = vrot.slane %v267_v48, %v5684_v18  ;;  %v216_v9 = vcombine.low %v43_v3, %v44_v4  ;;  %v116_v11 = vcombine.low %v44_v4, %v45_v5  ;;  %v215_v20 = vcombine.low %v5714_v30, %v42_v2  ;;  %v5129_v24 = vld [vmem:[%s7154_s1 + $0xd4] ss:$8 sps:$4 sm:$0xff]   ;;  %v5131_v33 = vld [vmem:[%s7154_s1 + $0xd0] ss:$8 sps:$4 sm:$0xff]   ;;  %v5132_v36 = vld [vmem:[%s7154_s1 + $0xe4] ss:$8 sps:$4 sm:$0xff]  }
   0xf   :  { %866 = vmatpush1.bf16.msra.mxu0 %v5101_v7  ;;  %v213_v54 = vrot.slane %v199_v50, %v5684_v18  ;;  %v5755_v55 = vrot.slane %v268_v51, %v5684_v18  ;;  %v47_v7 = vld [vmem:[%s7153_s0 + $0xd] sm:$0x1]  ;;  %v5822_v31 = vrot.slane %v98_v14, %v5684_v18  ;;  %v5134_v44 = vld [vmem:[%s7154_s1 + $0xe0] ss:$8 sps:$4 sm:$0xff]   ;;  %v49_v47 = vld [vmem:[%s7153_s0 + $0xf] sm:$0x1] }
  0x10   :  { %867 = vmatprep.subr.bf16.mxu0 %v5102_v8  ;;  %v48_v8 = vld [vmem:[%s7153_s0 + $0xe] sm:$0x1]  ;;  %v232_v22 = vrot.slane %v216_v9, %v5684_v18  ;;  %v117_v30 = vcombine.low %v46_v6, %v47_v7  ;;  %v5135_v48 = vld [vmem:[%s7154_s1 + $0xf4] ss:$8 sps:$4 sm:$0xff]   ;;  %v5137_v51 = vld [vmem:[%s7154_s1 + $0xf0] ss:$8 sps:$4 sm:$0xff]  }
  0x11   :  { %v214_v58 = vcombine.low %v206_v52, %v213_v54  ;;  %v283_v59 = vcombine.low %v5751_v53, %v5755_v55  ;;  %v218_v21 = vcombine.low %v47_v7, %v48_v8  ;;  %v5140_v52 = vld [vmem:[%s7154_s1 + $0x104] ss:$8 sps:$4 sm:$0xff]   ;;  %v5138_v2 = vld [vmem:[%s7154_s1 + $0x100] ss:$8 sps:$4 sm:$0xff]   ;;  %v5143_v4 = vld [vmem:[%s7154_s1 + $0x114] ss:$8 sps:$4 sm:$0xff]  }
  0x12   :  { %v145_v42 = vrot.slane %v117_v30, %v5684_v18  ;;  %v5156_v30 = vld [vmem:[%s7154_s1 + $0x160] ss:$8 sps:$4 sm:$0xff]   ;;  %v5195_v53 = vld [vmem:[%s7154_s1 + $0x230] ss:$8 sps:$4 sm:$0xff]   ;;  %v5200_v55 = vld [vmem:[%s7154_s1 + $0x244] ss:$8 sps:$4 sm:$0xff]  }
  0x13   :  { %868 = vmatpush1.bf16.msra.mxu0 %v5104_v12  ;;  %891 = vmatprep.mubr.bf16.mxu0 %v214_v58  ;;  %v65_v12 = vcombine.low %v5587_v26, %v5587_v26  ;;  %v246_v35 = vrot.slane %v218_v21, %v5684_v18 }
  0x14   :  { %869 = vmatprep.subr.bf16.mxu0 %v5105_v13  ;;  %v217_v13 = vcombine.low %v45_v5, %v46_v6 }
  0x15   :  { %v5819_v28 = vrot.slane %v65_v12, %v5684_v18 }
  0x16   :  { %v239_v23 = vrot.slane %v217_v13, %v5684_v18 }
  0x17   :  { %870 = vmatpush1.bf16.msra.mxu0 %v5107_v16  ;;  %v131_v16 = vrot.slane %v115_v10, %v5684_v18  ;;  %v97_v38 = vcombine.low %v5819_v28, %v5728_v41  ;;  %v328_v41 = vcombine.low %v49_v47, %v5587_v26  ;;  %v311_v10 = vcombine.low %v5722_v39, %v5725_v40  ;;  %v5146_v39 = vld [vmem:[%s7154_s1 + $0x124] ss:$8 sps:$4 sm:$0xff]  }
  0x18   :  { %871 = vmatprep.subr.bf16.mxu0 %v5108_v17  ;;  %v138_v17 = vrot.slane %v116_v11, %v5684_v18  ;;  %v336_v29 = vcombine.low %v232_v22, %v239_v23 }
  0x19   :  { %v146_v25 = vcombine.low %v124_v45, %v131_v16  ;;  %v105_v50 = vrot.slane %v97_v38, %v5684_v18  ;;  %v319_v40 = vrot.slane %v311_v10, %v5684_v18  ;;  %v5167_v38 = vld [vmem:[%s7154_s1 + $0x194] ss:$8 sps:$4 sm:$0xff]  }
  0x1a   :  { %v292_v27 = vcombine.low %v131_v16, %v138_v17  ;;  %v147_v54 = vcombine.low %v138_v17, %v145_v42  ;;  %v5141_v16 = vld [vmem:[%s7154_s1 + $0x110] ss:$8 sps:$4 sm:$0xff]   ;;  %v5144_v17 = vld [vmem:[%s7154_s1 + $0x120] ss:$8 sps:$4 sm:$0xff]  }
  0x1b   :  { %872 = vmatpush1.bf16.msra.mxu0 %v5110_v19  ;;  %v5128_v19 = vld [vmem:[%s7154_s1 + $0xc0] ss:$8 sps:$4 sm:$0xff]   ;;  %v5825_v32 = vrot.slane %v146_v25, %v5684_v18  ;;  %v113_v3 = vcombine.low %v105_v50, %v5822_v31  ;;  %v5155_v25 = vld [vmem:[%s7154_s1 + $0x154] ss:$8 sps:$4 sm:$0xff]   ;;  %v5177_v50 = vld [vmem:[%s7154_s1 + $0x1d0] ss:$8 sps:$4 sm:$0xff]  }
  0x1c   :  { %873 = vmatprep.subr.bf16.mxu0 %v5111_v34  ;;  %v225_v34 = vrot.slane %v215_v20, %v5684_v18  ;;  %v5874_v5 = vrot.slane %v147_v54, %v5684_v18  ;;  %v5185_v54 = vld [vmem:[%s7154_s1 + $0x1f4] ss:$8 sps:$4 sm:$0xff]  }
  0x1d   :  { %v355_v37 = vcombine.low %v5822_v31, %v5825_v32 }
  0x1e   :  { %v247_v45 = vcombine.low %v225_v34, %v232_v22  ;;  %v312_v11 = vcombine.low %v5734_v43, %v225_v34  ;;  %v162_v20 = vcombine.low %v5825_v32, %v5874_v5  ;;  %v5147_v22 = vld [vmem:[%s7154_s1 + $0x130] ss:$8 sps:$4 sm:$0xff]  }
  0x1f   :  { %874 = vmatpush1.bf16.msra.mxu0 %v5113_v46  ;;  %v248_v46 = vcombine.low %v239_v23, %v246_v35  ;;  %v5152_v23 = vld [vmem:[%s7154_s1 + $0x144] ss:$8 sps:$4 sm:$0xff]   ;;  %v5159_v34 = vld [vmem:[%s7154_s1 + $0x170] ss:$8 sps:$4 sm:$0xff]  }
  0x20   :  { %875 = vmatprep.subr.bf16.mxu0 %v5114_v49  ;;  %v284_v49 = vcombine.low %v48_v8, %v49_v47  ;;  %v255_v58 = vrot.slane %v247_v45, %v5684_v18  ;;  %v326_v43 = vrot.slane %v312_v11, %v5684_v18  ;;  %v5168_v45 = vld [vmem:[%s7154_s1 + $0x1a0] ss:$8 sps:$4 sm:$0xff]   ;;  %v5171_v47 = vld [vmem:[%s7154_s1 + $0x1b0] ss:$8 sps:$4 sm:$0xff]  }
  0x22   :  { %v327_v21 = vcombine.low %v319_v40, %v326_v43 }
  0x23   :  { %876 = vmatpush1.bf16.msra.mxu0 %v5116_v56  ;;  %v335_v56 = vrot.slane %v328_v41, %v5684_v18  ;;  %v5174_v41 = vld [vmem:[%s7154_s1 + $0x1c0] ss:$8 sps:$4 sm:$0xff]  }
  0x24   :  { %877 = vmatprep.subr.bf16.mxu0 %v5117_v57  ;;  %v291_v57 = vrot.slane %v284_v49, %v5684_v18  ;;  %v5179_v49 = vld [vmem:[%s7154_s1 + $0x1d4] ss:$8 sps:$4 sm:$0xff]  }
  0x27   :  { %878 = vmatpush1.bf16.msra.mxu0 %v5119_v60  ;;  %v262_v60 = vrot.slane %v248_v46, %v5684_v18  ;;  %v5173_v46 = vld [vmem:[%s7154_s1 + $0x1b4] ss:$8 sps:$4 sm:$0xff]  }
  0x28   :  { %879 = vmatprep.subr.bf16.mxu0 %v5120_v61  ;;  %v5862_v61 = vrot.slane %v292_v27, %v5684_v18  ;;  %v5153_v27 = vld [vmem:[%s7154_s1 + $0x150] ss:$8 sps:$4 sm:$0xff]  }
  0x29   :  { %v263_v9 = vcombine.low %v255_v58, %v262_v60  ;;  %v5186_v58 = vld [vmem:[%s7154_s1 + $0x200] ss:$8 sps:$4 sm:$0xff]   ;;  %v5191_v60 = vld [vmem:[%s7154_s1 + $0x214] ss:$8 sps:$4 sm:$0xff]  }
  0x2b   :  { %880 = vmatpush1.bf16.msra.mxu0 %v5122_v62  ;;  %v337_v62 = vcombine.low %v246_v35, %v335_v56  ;;  %v5164_v35 = vld [vmem:[%s7154_s1 + $0x184] ss:$8 sps:$4 sm:$0xff]   ;;  %v5183_v56 = vld [vmem:[%s7154_s1 + $0x1f0] ss:$8 sps:$4 sm:$0xff]  }
  0x2c   :  { %881 = vmatprep.subr.bf16.mxu0 %v5123_v63  ;;  %v344_v63 = vrot.slane %v336_v29, %v5684_v18  ;;  %v5158_v29 = vld [vmem:[%s7154_s1 + $0x164] ss:$8 sps:$4 sm:$0xff]  }
  0x2d   :  { %v351_v6 = vrot.slane %v337_v62, %v5684_v18  ;;  %v5189_v62 = vld [vmem:[%s7154_s1 + $0x210] ss:$8 sps:$4 sm:$0xff]  }
  0x2f   :  { %882 = vmatpush1.bf16.msra.mxu0 %v5125_v0  ;;  %v293_v0 = vcombine.low %v145_v42, %v291_v57  ;;  %v5886_v12 = vcombine.low %v344_v63, %v351_v6  ;;  %v5165_v42 = vld [vmem:[%s7154_s1 + $0x190] ss:$8 sps:$4 sm:$0xff]   ;;  %v5194_v63 = vld [vmem:[%s7154_s1 + $0x224] ss:$8 sps:$4 sm:$0xff]   ;;  %v5209_v6 = vld [vmem:[%s7154_s1 + $0x274] ss:$8 sps:$4 sm:$0xff]  }
  0x30   :  { %883 = vmatprep.subr.bf16.mxu0 %v5126_v1  ;;  %v356_v1 = vcombine.low %v291_v57, %v5819_v28  ;;  %v5188_v57 = vld [vmem:[%s7154_s1 + $0x204] ss:$8 sps:$4 sm:$0xff]  }
  0x31   :  { %v5878_v7 = vrot.slane %v293_v0, %v5684_v18  ;;  %v5192_v0 = vld [vmem:[%s7154_s1 + $0x220] ss:$8 sps:$4 sm:$0xff]  }
  0x32   :  { %v5881_v8 = vrot.slane %v356_v1, %v5684_v18  ;;  %v5197_v1 = vld [vmem:[%s7154_s1 + $0x234] ss:$8 sps:$4 sm:$0xff]  }
  0x33   :  { %884 = vmatpush1.bf16.msra.mxu0 %v5128_v19  ;;  %v308_v13 = vcombine.low %v5862_v61, %v5878_v7  ;;  %v5149_v19 = vld [vmem:[%s7154_s1 + $0x134] ss:$8 sps:$4 sm:$0xff]   ;;  %v5206_v61 = vld [vmem:[%s7154_s1 + $0x264] ss:$8 sps:$4 sm:$0xff]   ;;  %v5207_v7 = vld [vmem:[%s7154_s1 + $0x270] ss:$8 sps:$4 sm:$0xff]  }
  0x34   :  { %885 = vmatprep.subr.bf16.mxu0 %v5129_v24  ;;  %v364_v14 = vcombine.low %v5874_v5, %v5881_v8  ;;  %v5150_v24 = vld [vmem:[%s7154_s1 + $0x140] ss:$8 sps:$4 sm:$0xff]  }
  0x37   :  { %886 = vmatpush1.bf16.msra.mxu0 %v5131_v33  ;;  %v5161_v33 = vld [vmem:[%s7154_s1 + $0x174] ss:$8 sps:$4 sm:$0xff]  }
  0x38   :  { %887 = vmatprep.subr.bf16.mxu0 %v5132_v36  ;;  %v5162_v36 = vld [vmem:[%s7154_s1 + $0x180] ss:$8 sps:$4 sm:$0xff]  }
  0x3b   :  { %888 = vmatpush1.bf16.msra.mxu0 %v5134_v44  ;;  %v5170_v44 = vld [vmem:[%s7154_s1 + $0x1a4] ss:$8 sps:$4 sm:$0xff]  }
  0x3c   :  { %889 = vmatprep.subr.bf16.mxu0 %v5135_v48  ;;  %v5176_v48 = vld [vmem:[%s7154_s1 + $0x1c4] ss:$8 sps:$4 sm:$0xff]  }
  0x3f   :  { %890 = vmatpush1.bf16.msra.mxu0 %v5137_v51  ;;  %v5182_v51 = vld [vmem:[%s7154_s1 + $0x1e4] ss:$8 sps:$4 sm:$0xff]  }
  0x40   :  { %912 = vmatprep.subr.bf16.mxu0 %v5140_v52  ;;  %v5180_v52 = vld [vmem:[%s7154_s1 + $0x1e0] ss:$8 sps:$4 sm:$0xff]  }
  0x42   :  { %892 = vmatmul.mubr.bf16.vlgmr.msra.gmra.mrb[0].mxu0 %v113_v3  ;;  %v5201_v3 = vld [vmem:[%s7154_s1 + $0x250] ss:$8 sps:$4 sm:$0xff]  }
  0x43   :  { %913 = vmatpush1.bf16.msra.mxu0 %v5138_v2  ;;  %901 = vmatprep.mubr.bf16.mxu0 %v263_v9  ;;  %v5203_v2 = vld [vmem:[%s7154_s1 + $0x254] ss:$8 sps:$4 sm:$0xff]  }
  0x44   :  { %914 = vmatprep.subr.bf16.mxu0 %v5143_v4  ;;  %v5204_v4 = vld [vmem:[%s7154_s1 + $0x260] ss:$8 sps:$4 sm:$0xff]  }
  0x47   :  { %915 = vmatpush1.bf16.msra.mxu0 %v5141_v16 }
  0x48   :  { %916 = vmatprep.subr.bf16.mxu0 %v5146_v39 }
  0x4a   :  { %902 = vmatmul.mubr.bf16.gmra.mrb[4].mxu0 %v162_v20 }
  0x4b   :  { %917 = vmatpush1.bf16.msra.mxu0 %v5144_v17  ;;  %944 = vmatprep.mubr.bf16.mxu0 %v327_v21 }
  0x4c   :  { %918 = vmatprep.subr.bf16.mxu0 %v5149_v19 }
  0x4f   :  { %919 = vmatpush1.bf16.msra.mxu0 %v5147_v22 }
  0x50   :  { %920 = vmatprep.subr.bf16.mxu0 %v5152_v23 }
  0x53   :  { %921 = vmatpush1.bf16.msra.mxu0 %v5150_v24 }
  0x54   :  { %922 = vmatprep.subr.bf16.mxu0 %v5155_v25 }
  0x57   :  { %923 = vmatpush1.bf16.msra.mxu0 %v5153_v27 }
  0x58   :  { %924 = vmatprep.subr.bf16.mxu0 %v5158_v29 }
  0x5b   :  { %925 = vmatpush1.bf16.msra.mxu0 %v5156_v30 }
  0x5c   :  { %926 = vmatprep.subr.bf16.mxu0 %v5161_v33 }
  0x5f   :  { %927 = vmatpush1.bf16.msra.mxu0 %v5159_v34 }
  0x60   :  { %928 = vmatprep.subr.bf16.mxu0 %v5164_v35 }
  0x63   :  { %929 = vmatpush1.bf16.msra.mxu0 %v5162_v36 }
  0x64   :  { %930 = vmatprep.subr.bf16.mxu0 %v5167_v38 }
  0x67   :  { %931 = vmatpush1.bf16.msra.mxu0 %v5165_v42 }
  0x68   :  { %932 = vmatprep.subr.bf16.mxu0 %v5170_v44 }
  0x6b   :  { %933 = vmatpush1.bf16.msra.mxu0 %v5168_v45 }
  0x6c   :  { %934 = vmatprep.subr.bf16.mxu0 %v5173_v46 }
  0x6f   :  { %935 = vmatpush1.bf16.msra.mxu0 %v5171_v47 }
  0x70   :  { %936 = vmatprep.subr.bf16.mxu0 %v5176_v48 }
  0x73   :  { %937 = vmatpush1.bf16.msra.mxu0 %v5174_v41 }
  0x74   :  { %938 = vmatprep.subr.bf16.mxu0 %v5179_v49 }
  0x77   :  { %939 = vmatpush1.bf16.msra.mxu0 %v5177_v50 }
  0x78   :  { %940 = vmatprep.subr.bf16.mxu0 %v5182_v51 }
  0x7b   :  { %941 = vmatpush1.bf16.msra.mxu0 %v5180_v52 }
  0x7c   :  { %942 = vmatprep.subr.bf16.mxu0 %v5185_v54 }
  0x7f   :  { %943 = vmatpush1.bf16.msra.mxu0 %v5183_v56 }
  0x80   :  { %965 = vmatprep.subr.bf16.mxu0 %v5188_v57 }
  0x82   :  { %945 = vmatmul.mubr.bf16.vlgmr.msra.gmra.mrb[0].mxu0 %v283_v59  ;;  %v5198_v59 = vld [vmem:[%s7154_s1 + $0x240] ss:$8 sps:$4 sm:$0xff]  }
  0x83   :  { %966 = vmatpush1.bf16.msra.mxu0 %v5186_v58  ;;  %954 = vmatprep.mubr.bf16.mxu0 %v5886_v12 }
  0x84   :  { %967 = vmatprep.subr.bf16.mxu0 %v5191_v60 }
  0x87   :  { %968 = vmatpush1.bf16.msra.mxu0 %v5189_v62 }
  0x88   :  { %969 = vmatprep.subr.bf16.mxu0 %v5194_v63 }
  0x8a   :  { %955 = vmatmul.mubr.bf16.gmra.mrb[4].mxu0 %v308_v13 }
  0x8b   :  { %970 = vmatpush1.bf16.msra.mxu0 %v5192_v0  ;;  %997 = vmatprep.mubr.bf16.mxu0 %v5587_v26 }
  0x8c   :  { %971 = vmatprep.subr.bf16.mxu0 %v5197_v1 }
  0x8f   :  { %972 = vmatpush1.bf16.msra.mxu0 %v5195_v53 }
  0x90   :  { %973 = vmatprep.subr.bf16.mxu0 %v5200_v55 }
  0x93   :  { %974 = vmatpush1.bf16.msra.mxu0 %v5198_v59 }
  0x94   :  { %975 = vmatprep.subr.bf16.mxu0 %v5203_v2 }
  0x97   :  { %976 = vmatpush1.bf16.msra.mxu0 %v5201_v3 }
  0x98   :  { %977 = vmatprep.subr.bf16.mxu0 %v5206_v61 }
  0x9b   :  { %978 = vmatpush1.bf16.msra.mxu0 %v5204_v4 }
  0x9c   :  { %979 = vmatprep.subr.bf16.mxu0 %v5209_v6 }
  0x9f   :  { %980 = vmatpush1.bf16.msra.mxu0 %v5207_v7 }
  0xa2   :  { %998 = vmatmul.mubr.bf16.vlgmr.msra.gmra.mrb[0].mxu0 %v355_v37 }
  0xa3   :  { %1007 = vmatprep.mubr.bf16.mxu0 %v5587_v26 }
  0xaa   :  { %1008 = vmatmul.mubr.bf16.gmra.mrb[4].mxu0 %v364_v14 }
  0xab   :  { %14 = vsyncpa [#allocation3], 0  ;;  %v5210_v9 = vld [vmem:[%s7156_s3 + $0x4] ss:$8 sps:$4 sm:$0xff]   ;;  %v5212_v10 = vld [vmem:[%s7156_s3] ss:$8 sps:$4 sm:$0xff]  }
  0xac   :  { %v5213_v31 = vld [vmem:[%s7156_s3 + $0x14] ss:$8 sps:$4 sm:$0xff]   ;;  %2708 = vmatprep.subr.bf16.mxu1 %v5210_v9  ;;  %v5215_v26 = vld [vmem:[%s7156_s3 + $0x10] ss:$8 sps:$4 sm:$0xff]   ;;  %v5216_v32 = vld [vmem:[%s7156_s3 + $0x24] ss:$8 sps:$4 sm:$0xff]  }
  0xad   :  { %2709 = vmatpush1.bf16.msra.mxu1 %v5212_v10  ;;  %v5218_v37 = vld [vmem:[%s7156_s3 + $0x20] ss:$8 sps:$4 sm:$0xff]   ;;  %v5219_v5 = vld [vmem:[%s7156_s3 + $0x34] ss:$8 sps:$4 sm:$0xff]   ;;  %v5221_v8 = vld [vmem:[%s7156_s3 + $0x30] ss:$8 sps:$4 sm:$0xff]  }
  0xae   :  { %2710 = vmatprep.subr.bf16.mxu1 %v5213_v31  ;;  %v5222_v11 = vld [vmem:[%s7156_s3 + $0x44] ss:$8 sps:$4 sm:$0xff]   ;;  %v5224_v12 = vld [vmem:[%s7156_s3 + $0x40] ss:$8 sps:$4 sm:$0xff]   ;;  %v5225_v13 = vld [vmem:[%s7156_s3 + $0x54] ss:$8 sps:$4 sm:$0xff]  }
  0xaf   :  { %v5227_v14 = vld [vmem:[%s7156_s3 + $0x50] ss:$8 sps:$4 sm:$0xff]   ;;  %v451_v16 = vsub.s32 0, %v5675_v15  ;;  %v447_v39 = vld [vmem:[%s7155_s2] sm:$0x3]  ;;  %v455_v40 = vsub.s32 1, %v5675_v15 }
  0xb0   :  { %v5588_v43 = vmov 1983009808   ;;  %v5228_v50 = vld [vmem:[%s7156_s3 + $0x64] ss:$8 sps:$4 sm:$0xff]   ;;  %v5230_v51 = vld [vmem:[%s7156_s3 + $0x60] ss:$8 sps:$4 sm:$0xff]  }
  0xb1   :  { %2711 = vmatpush1.bf16.msra.mxu1 %v5215_v26  ;;  %v1037_v17 = vunpack.c.l.s4 %v5588_v43  ;;  %v452_v19 = vrot.slane %v447_v39, %v451_v16  ;;  %v456_v20 = vrot.slane %v447_v39, %v455_v40  ;;  %v5231_v7 = vld [vmem:[%s7156_s3 + $0x74] ss:$8 sps:$4 sm:$0xff]   ;;  %v5233_v26 = vld [vmem:[%s7156_s3 + $0x70] ss:$8 sps:$4 sm:$0xff]   ;;  %v5234_v39 = vld [vmem:[%s7156_s3 + $0x84] ss:$8 sps:$4 sm:$0xff]  }
  0xb2   :  { %2712 = vmatprep.subr.bf16.mxu1 %v5216_v32  ;;  %s5589_s20 = smov 112   ;;  %vm1182_vm0 = vcmask 916480   ;;  %s5590_s1 = smov 96   ;;  %vm3005_vm1 = vcmask 785408   ;;  %vm4504_vm2 = vcmask 74752  }
  0xb3   :  { %v1038_v22 = vunpack.c.0.s8 %v1037_v17 }
  0xb5   :  { %2713 = vmatpush1.bf16.msra.mxu1 %v5218_v37  ;;  %v6092_v35 = vsub.s32 %v1038_v22, %v5675_v15 }
  0xb6   :  { %2714 = vmatprep.subr.bf16.mxu1 %v5219_v5 }
  0xb9   :  { %2715 = vmatpush1.bf16.msra.mxu1 %v5221_v8 }
  0xba   :  { %2716 = vmatprep.subr.bf16.mxu1 %v5222_v11 }
  0xbd   :  { %2717 = vmatpush1.bf16.msra.mxu1 %v5224_v12 }
  0xbe   :  { %2718 = vmatprep.subr.bf16.mxu1 %v5225_v13 }
  0xc1   :  { %2719 = vmatpush1.bf16.msra.mxu1 %v5227_v14 }
  0xc2   :  { %2720 = vmatprep.subr.bf16.mxu1 %v5228_v50  ;;  %v5243_v50 = vld [vmem:[%s7156_s3 + $0xb4] ss:$8 sps:$4 sm:$0xff]  }
  0xc5   :  { %2721 = vmatpush1.bf16.msra.mxu1 %v5230_v51  ;;  %v5245_v51 = vld [vmem:[%s7156_s3 + $0xb0] ss:$8 sps:$4 sm:$0xff]  }
  0xc6   :  { %2722 = vmatprep.subr.bf16.mxu1 %v5231_v7 }
  0xc9   :  { %2723 = vmatpush1.bf16.msra.mxu1 %v5233_v26 }
  0xca   :  { %2724 = vmatprep.subr.bf16.mxu1 %v5234_v39 }
 0x175   :  { %v999_v21 = vpop.f32.mrb[0].mxu0 }
 0x176   :  { %v5040_v23 = vadd.f32 %v999_v21, %v452_v19  ;;  %v1001_v24 = vpop.f32.mrb[1].mxu0 }
 0x177   :  { %v5041_v25 = vadd.f32 %v1001_v24, %v456_v20  ;;  %v1003_v27 = vpop.f32.mrb[2].mxu0 }
 0x178   :  { %v1018_v29 = vmax.f32 %v5040_v23, 0.0  ;;  %v5042_v30 = vadd.f32 %v1003_v27, %v452_v19  ;;  %v1005_v33 = vpop.f32.mrb[3].mxu0 }
 0x179   :  { %v1019_v34 = vmax.f32 %v5041_v25, 0.0  ;;  %v5043_v36 = vadd.f32 %v1005_v33, %v456_v20 }
 0x17a   :  { %v1020_v38 = vmax.f32 %v5042_v30, 0.0 }
 0x17b   :  { %v1034_v42 = vcombine.low %v1018_v29, %v1019_v34  ;;  %v1035_v44 = vcombine.high %v1018_v29, %v1019_v34  ;;  %v1021_v45 = vmax.f32 %v5043_v36, 0.0 }
 0x17d   :  { %v1042_v46 = vrot.slane %v1034_v42, %v6092_v35  ;;  %v1049_v47 = vrot.slane %v1035_v44, %v6092_v35  ;;  %v1052_v48 = vcombine.low %v1020_v38, %v1021_v45  ;;  %v1053_v41 = vcombine.high %v1020_v38, %v1021_v45  ;;  %v1009_v49 = vpop.f32.mrb[4].mxu0  ;;  %v5237_v38 = vld [vmem:[%s7156_s3 + $0x94] ss:$8 sps:$4 sm:$0xff]   ;;  %v5239_v44 = vld [vmem:[%s7156_s3 + $0x90] ss:$8 sps:$4 sm:$0xff]  }
 0x17e   :  { %v5044_v52 = vadd.f32 %v1009_v49, %v452_v19  ;;  %v1011_v54 = vpop.f32.mrb[5].mxu0 }
 0x17f   :  { %v1050_v56 = vcombine.high %v1042_v46, %v1042_v46  ;;  %v1051_v57 = vcombine.high %v1049_v47, %v1049_v47  ;;  %v1060_v58 = vrot.slane %v1052_v48, %v6092_v35  ;;  %v1067_v60 = vrot.slane %v1053_v41, %v6092_v35  ;;  %v1013_v62 = vpop.f32.mrb[6].mxu0  ;;  %v5240_v48 = vld [vmem:[%s7156_s3 + $0xa4] ss:$8 sps:$4 sm:$0xff]   ;;  %v5242_v41 = vld [vmem:[%s7156_s3 + $0xa0] ss:$8 sps:$4 sm:$0xff]  }
 0x180   :  { %v1022_v63 = vmax.f32 %v5044_v52, 0.0  ;;  %v5045_v0 = vadd.f32 %v1011_v54, %v456_v20  ;;  %v5046_v1 = vadd.f32 %v1013_v62, %v452_v19  ;;  %v1015_v53 = vpop.f32.mrb[7].mxu0  ;;  %v5236_v19 = vld [vmem:[%s7156_s3 + $0x80] ss:$8 sps:$4 sm:$0xff]   ;;  %v5246_v54 = vld [vmem:[%s7156_s3 + $0xc4] ss:$8 sps:$4 sm:$0xff]  }
 0x181   :  { %v6104_v55 = vmax.f32 %v1042_v46, %v1050_v56  ;;  %v6106_v59 = vmax.f32 %v1049_v47, %v1051_v57  ;;  %v1068_v2 = vcombine.high %v1060_v58, %v1060_v58  ;;  %v1069_v3 = vcombine.high %v1067_v60, %v1067_v60  ;;  %2725 = vmatpush1.bf16.msra.mxu1 %v5236_v19  ;;  %v5248_v56 = vld [vmem:[%s7156_s3 + $0xc0] ss:$8 sps:$4 sm:$0xff]   ;;  %v5249_v57 = vld [vmem:[%s7156_s3 + $0xd4] ss:$8 sps:$4 sm:$0xff]  }
 0x182   :  { %v1023_v61 = vmax.f32 %v5045_v0, 0.0  ;;  %v1024_v4 = vmax.f32 %v5046_v1, 0.0  ;;  %v5047_v6 = vadd.f32 %v1015_v53, %v456_v20  ;;  %2726 = vmatprep.subr.bf16.mxu1 %v5237_v38  ;;  %v5254_v62 = vld [vmem:[%s7156_s3 + $0xe0] ss:$8 sps:$4 sm:$0xff]   ;;  %v5257_v0 = vld [vmem:[%s7156_s3 + $0xf0] ss:$8 sps:$4 sm:$0xff]  }
 0x183   :  { %v6111_v9 = vmax.f32 %v1060_v58, %v1068_v2  ;;  %v6113_v10 = vmax.f32 %v1067_v60, %v1069_v3  ;;  %v1138_v31 = vcombine.low %v6104_v55, %v6106_v59  ;;  %v5251_v58 = vld [vmem:[%s7156_s3 + $0xd0] ss:$8 sps:$4 sm:$0xff]   ;;  %v5252_v60 = vld [vmem:[%s7156_s3 + $0xe4] ss:$8 sps:$4 sm:$0xff]  }
 0x184   :  { %v1070_v32 = vcombine.low %v1022_v63, %v1023_v61  ;;  %v1071_v37 = vcombine.high %v1022_v63, %v1023_v61  ;;  %v1025_v5 = vmax.f32 %v5047_v6, 0.0  ;;  %v5255_v63 = vld [vmem:[%s7156_s3 + $0xf4] ss:$8 sps:$4 sm:$0xff]   ;;  %v5260_v1 = vld [vmem:[%s7156_s3 + $0x104] ss:$8 sps:$4 sm:$0xff]  }
 0x185   :  { %v1139_v8 = vcombine.low %v6111_v9, %v6113_v10  ;;  %v1146_v43 = vrot.slane %v1138_v31, %v6092_v35  ;;  %2727 = vmatpush1.bf16.msra.mxu1 %v5239_v44 }
 0x186   :  { %v1078_v11 = vrot.slane %v1070_v32, %v6092_v35  ;;  %v1085_v12 = vrot.slane %v1071_v37, %v6092_v35  ;;  %v1088_v13 = vcombine.low %v1024_v4, %v1025_v5  ;;  %v1089_v14 = vcombine.high %v1024_v4, %v1025_v5  ;;  %2728 = vmatprep.subr.bf16.mxu1 %v5240_v48 }
 0x187   :  { %v1153_v17 = vrot.slane %v1139_v8, %v6092_v35 }
 0x188   :  { %v1086_v20 = vcombine.high %v1078_v11, %v1078_v11  ;;  %v1087_v21 = vcombine.high %v1085_v12, %v1085_v12  ;;  %v1096_v22 = vrot.slane %v1088_v13, %v6092_v35  ;;  %v1103_v23 = vrot.slane %v1089_v14, %v6092_v35 }
 0x189   :  { %v1154_v24 = vcombine.low %v1146_v43, %v1153_v17  ;;  %v1155_v42 = vcombine.high %v1146_v43, %v1153_v17  ;;  %2729 = vmatpush1.bf16.msra.mxu1 %v5242_v41 }
 0x18a   :  { %v6134_v25 = vmax.f32 %v1078_v11, %v1086_v20  ;;  %v6136_v27 = vmax.f32 %v1085_v12, %v1087_v21  ;;  %v1104_v29 = vcombine.high %v1096_v22, %v1096_v22  ;;  %v1105_v30 = vcombine.high %v1103_v23, %v1103_v23  ;;  %2730 = vmatprep.subr.bf16.mxu1 %v5243_v50 }
 0x18b   :  { %1174 = vrot.lane.b32.xlu0 %v1154_v24, %s5589_s20 }
 0x18c   :  { %v6138_v33 = vmax.f32 %v1096_v22, %v1104_v29  ;;  %v6140_v34 = vmax.f32 %v1103_v23, %v1105_v30  ;;  %v1156_v36 = vcombine.low %v6134_v25, %v6136_v27 }
 0x18d   :  { %2731 = vmatpush1.bf16.msra.mxu1 %v5245_v51 }
 0x18e   :  { %v1157_v45 = vcombine.low %v6138_v33, %v6140_v34  ;;  %v1164_v46 = vrot.slane %v1156_v36, %v6092_v35  ;;  %2732 = vmatprep.subr.bf16.mxu1 %v5246_v54 }
 0x18f   :  { %1176 = vrot.lane.b32.xlu0 %v1155_v42, %s5589_s20 }
 0x190   :  { %v1171_v47 = vrot.slane %v1157_v45, %v6092_v35 }
 0x191   :  { %2733 = vmatpush1.bf16.msra.mxu1 %v5248_v56 }
 0x192   :  { %v1172_v49 = vcombine.low %v1164_v46, %v1171_v47  ;;  %v1173_v52 = vcombine.high %v1164_v46, %v1171_v47  ;;  %2734 = vmatprep.subr.bf16.mxu1 %v5249_v57 }
 0x194   :  { %1178 = vrot.lane.b32.xlu1 %v1172_v49, %s5589_s20 }
 0x195   :  { %2735 = vmatpush1.bf16.msra.mxu1 %v5251_v58 }
 0x196   :  { %2736 = vmatprep.subr.bf16.mxu1 %v5252_v60 }
 0x198   :  { %1180 = vrot.lane.b32.xlu1 %v1173_v52, %s5589_s20 }
 0x199   :  { %2737 = vmatpush1.bf16.msra.mxu1 %v5254_v62 }
 0x19a   :  { %2738 = vmatprep.subr.bf16.mxu1 %v5255_v63 }
 0x19d   :  { %2739 = vmatpush1.bf16.msra.mxu1 %v5257_v0 }
 0x19e   :  { %2751 = vmatprep.subr.bf16.mxu1 %v5260_v1 }
 0x1fd   :  { %v1175_v53 = vpop.permute.xlu0 %1174 }
 0x201   :  { %v1177_v2 = vpop.permute.xlu0 %1176 }
 0x202   :  { %v1183_v3 = vsel %vm1182_vm0, %v1175_v53, %v1177_v2  ;;  %v1189_v61 = vsel %vm1182_vm0, %v1177_v2, %v1175_v53 }
 0x203   :  { %v1193_v4 = vcombine.low %v1183_v3, %v1189_v61  ;;  %v1194_v6 = vcombine.high %v1183_v3, %v1189_v61 }
 0x205   :  { %v1201_v7 = vrot.slane %v1193_v4, %v6092_v35  ;;  %v1208_v31 = vrot.slane %v1194_v6, %v6092_v35 }
 0x206   :  { %v1179_v26 = vpop.permute.xlu1 %1178 }
 0x207   :  { %v1209_v32 = vcombine.high %v1201_v7, %v1201_v7  ;;  %v1210_v37 = vcombine.high %v1208_v31, %v1208_v31  ;;  %v1237_v5 = vmax.f32 %v6104_v55, %v1201_v7  ;;  %v1239_v8 = vmax.f32 %v6111_v9, %v1208_v31 }
 0x209   :  { %v1238_v11 = vmax.f32 %v6106_v59, %v1209_v32  ;;  %v1240_v12 = vmax.f32 %v6113_v10, %v1210_v37  ;;  %v1259_v13 = vrot.slane %v1237_v5, %v6092_v35  ;;  %v1275_v14 = vrot.slane %v1239_v8, %v6092_v35 }
 0x20a   :  { %v1181_v39 = vpop.permute.xlu1 %1180  ;;  %v6209_v10 = vrot.slane %v5819_v28, %v5684_v18 }
 0x20b   :  { %v1260_v43 = vcombine.high %v1259_v13, %v1259_v13  ;;  %v1267_v17 = vrot.slane %v1238_v11, %v6092_v35  ;;  %v1276_v19 = vcombine.high %v1275_v14, %v1275_v14  ;;  %v1283_v20 = vrot.slane %v1240_v12, %v6092_v35 }
 0x20c   :  { %v1184_v21 = vsel %vm1182_vm0, %v1179_v26, %v1181_v39  ;;  %v1190_v55 = vsel %vm1182_vm0, %v1181_v39, %v1179_v26  ;;  %v1492_v46 = vcombine.low %v6209_v10, %v6209_v10 }
 0x20d   :  { %v1268_v9 = vcombine.high %v1267_v17, %v1267_v17  ;;  %v1284_v22 = vcombine.high %v1283_v20, %v1283_v20  ;;  %v4600_v59 = vpack.c.bf16 %v1260_v43, %v1259_v13  ;;  %v4602_v23 = vpack.c.bf16 %v1276_v19, %v1275_v14 }
 0x20e   :  { %v1211_v24 = vcombine.low %v1184_v21, %v1190_v55  ;;  %v1212_v29 = vcombine.high %v1184_v21, %v1190_v55  ;;  %v6233_v61 = vrot.slane %v1492_v46, %v5684_v18 }
 0x20f   :  { %v1375_v30 = vrot.slane %v4600_v59, %v5684_v18  ;;  %v4601_v36 = vpack.c.bf16 %v1268_v9, %v1267_v17  ;;  %v1405_v38 = vrot.slane %v4602_v23, %v5684_v18  ;;  %v4603_v42 = vpack.c.bf16 %v1284_v22, %v1283_v20 }
 0x210   :  { %v1219_v44 = vrot.slane %v1211_v24, %v6092_v35  ;;  %v1226_v45 = vrot.slane %v1212_v29, %v6092_v35 }
 0x211   :  { %v1382_v47 = vrot.slane %v1375_v30, %v5684_v18  ;;  %v1390_v28 = vrot.slane %v4601_v36, %v5684_v18  ;;  %v1420_v48 = vrot.slane %v4603_v42, %v5684_v18  ;;  %v1412_v52 = vrot.slane %v1405_v38, %v5684_v18 }
 0x212   :  { %v1227_v41 = vcombine.high %v1219_v44, %v1219_v44  ;;  %v1228_v49 = vcombine.high %v1226_v45, %v1226_v45  ;;  %v1241_v50 = vmax.f32 %v6134_v25, %v1219_v44  ;;  %v1243_v51 = vmax.f32 %v6138_v33, %v1226_v45 }
 0x213   :  { %v1397_v54 = vrot.slane %v1390_v28, %v5684_v18  ;;  %v1427_v56 = vrot.slane %v1420_v48, %v5684_v18  ;;  %v1560_v57 = vcombine.low %v6209_v10, %v1382_v47 }
 0x214   :  { %v1242_v58 = vmax.f32 %v6136_v27, %v1227_v41  ;;  %v1244_v60 = vmax.f32 %v6140_v34, %v1228_v49  ;;  %v1291_v62 = vrot.slane %v1241_v50, %v6092_v35  ;;  %v1307_v63 = vrot.slane %v1243_v51, %v6092_v35 }
 0x215   :  { %v1493_v0 = vcombine.low %v1382_v47, %v1397_v54  ;;  %v1494_v25 = vcombine.low %v1412_v52, %v1427_v56  ;;  %v1561_v1 = vcombine.low %v1397_v54, %v1412_v52  ;;  %v1570_v34 = vrot.slane %v1560_v57, %v5684_v18 }
 0x216   :  { %v1292_v33 = vcombine.high %v1291_v62, %v1291_v62  ;;  %v1299_v53 = vrot.slane %v1242_v58, %v6092_v35  ;;  %v1308_v2 = vcombine.high %v1307_v63, %v1307_v63  ;;  %v1315_v3 = vrot.slane %v1244_v60, %v6092_v35 }
 0x217   :  { %v1509_v27 = vrot.slane %v1493_v0, %v5684_v18  ;;  %v6238_v4 = vrot.slane %v1561_v1, %v5684_v18  ;;  %v1516_v32 = vrot.slane %v1494_v25, %v5684_v18 }
 0x218   :  { %v1300_v6 = vcombine.high %v1299_v53, %v1299_v53  ;;  %v1316_v7 = vcombine.high %v1315_v3, %v1315_v3  ;;  %v4604_v31 = vpack.c.bf16 %v1292_v33, %v1291_v62  ;;  %v4606_v26 = vpack.c.bf16 %v1308_v2, %v1307_v63 }
 0x219   :  { %v1592_v37 = vcombine.low %v1570_v34, %v6238_v4  ;;  %v1525_v13 = vcombine.high %v6233_v61, %v1509_v27  ;;  %v1524_v17 = vcombine.low %v6233_v61, %v1509_v27  ;;  %v1593_v19 = vcombine.high %v1570_v34, %v6238_v4 }
 0x21a   :  { %v1435_v5 = vrot.slane %v4604_v31, %v5684_v18  ;;  %v4605_v8 = vpack.c.bf16 %v1300_v6, %v1299_v53  ;;  %v1467_v11 = vrot.slane %v4606_v26, %v5684_v18  ;;  %v4607_v12 = vpack.c.bf16 %v1316_v7, %v1315_v3  ;;  %v5263_v26 = vld [vmem:[%s7156_s3 + $0x114] ss:$8 sps:$4 sm:$0xff]  }
 0x21b   :  { %v1637_v20 = vcombine.high %v1509_v27, %v1516_v32  ;;  %v1636_v21 = vcombine.low %v1509_v27, %v1516_v32  ;;  %v1541_v23 = vrot.slane %v1525_v13, %v5684_v18  ;;  %v1534_v38 = vrot.slane %v1524_v17, %v5684_v18 }
 0x21c   :  { %v1442_v14 = vrot.slane %v1435_v5, %v5684_v18  ;;  %v1450_v39 = vrot.slane %v4605_v8, %v5684_v18  ;;  %v1484_v43 = vrot.slane %v4607_v12, %v5684_v18  ;;  %v1474_v55 = vrot.slane %v1467_v11, %v5684_v18 }
 0x21d   :  { %v1609_v42 = vrot.slane %v1593_v19, %v5684_v18  ;;  %v6258_v44 = vrot.slane %v1592_v37, %v5684_v18  ;;  %v6266_v41 = vrot.slane %v1637_v20, %v5684_v18  ;;  %v6269_v49 = vrot.slane %v1636_v21, %v5684_v18  ;;  %v5266_v19 = vld [vmem:[%s7156_s3 + $0x124] ss:$8 sps:$4 sm:$0xff]  }
 0x21e   :  { %v1491_v9 = vrot.slane %v1484_v43, %v5684_v18  ;;  %v1457_v22 = vrot.slane %v1450_v39, %v5684_v18  ;;  %v1562_v59 = vcombine.low %v1427_v56, %v1442_v14 }
 0x220   :  { %v1628_v24 = vcombine.low %v1474_v55, %v1491_v9  ;;  %v1495_v29 = vcombine.low %v1442_v14, %v1457_v22  ;;  %v1563_v30 = vcombine.low %v1457_v22, %v1474_v55  ;;  %v1584_v36 = vrot.slane %v1562_v59, %v5684_v18  ;;  %v5261_v14 = vld [vmem:[%s7156_s3 + $0x110] ss:$8 sps:$4 sm:$0xff]   ;;  %v5264_v55 = vld [vmem:[%s7156_s3 + $0x120] ss:$8 sps:$4 sm:$0xff]   ;;  %v5272_v59 = vld [vmem:[%s7156_s3 + $0x144] ss:$8 sps:$4 sm:$0xff]  }
 0x221   :  { %v1672_v45 = vcombine.low %v1491_v9, %v6209_v10  ;;  %v5269_v9 = vld [vmem:[%s7156_s3 + $0x134] ss:$8 sps:$4 sm:$0xff]   ;;  %v5267_v22 = vld [vmem:[%s7156_s3 + $0x130] ss:$8 sps:$4 sm:$0xff]  }
 0x222   :  { %v1523_v46 = vrot.slane %v1495_v29, %v5684_v18  ;;  %v1591_v47 = vrot.slane %v1563_v30, %v5684_v18  ;;  %v1635_v28 = vrot.slane %v1628_v24, %v5684_v18  ;;  %v1681_v48 = vcombine.high %v6238_v4, %v1584_v36  ;;  %v5275_v24 = vld [vmem:[%s7156_s3 + $0x154] ss:$8 sps:$4 sm:$0xff]   ;;  %v5273_v29 = vld [vmem:[%s7156_s3 + $0x150] ss:$8 sps:$4 sm:$0xff]   ;;  %v5278_v30 = vld [vmem:[%s7156_s3 + $0x164] ss:$8 sps:$4 sm:$0xff]  }
 0x223   :  { %v1679_v50 = vrot.slane %v1672_v45, %v5684_v18  ;;  %v1680_v51 = vcombine.low %v6238_v4, %v1584_v36  ;;  %v5258_v4 = vld [vmem:[%s7156_s3 + $0x100] ss:$8 sps:$4 sm:$0xff]   ;;  %v5284_v45 = vld [vmem:[%s7156_s3 + $0x184] ss:$8 sps:$4 sm:$0xff]  }
 0x224   :  { %v1527_v52 = vcombine.high %v1516_v32, %v1523_v46  ;;  %v1526_v54 = vcombine.low %v1516_v32, %v1523_v46  ;;  %v1595_v56 = vcombine.high %v1584_v36, %v1591_v47  ;;  %v1594_v57 = vcombine.low %v1584_v36, %v1591_v47  ;;  %v5276_v36 = vld [vmem:[%s7156_s3 + $0x160] ss:$8 sps:$4 sm:$0xff]  }
 0x225   :  { %v1639_v58 = vcombine.high %v1523_v46, %v1635_v28  ;;  %v1638_v60 = vcombine.low %v1523_v46, %v1635_v28  ;;  %v1683_v62 = vcombine.high %v1591_v47, %v1679_v50  ;;  %v6274_v63 = vrot.slane %v1681_v48, %v5684_v18  ;;  %v5282_v46 = vld [vmem:[%s7156_s3 + $0x180] ss:$8 sps:$4 sm:$0xff]   ;;  %v5290_v48 = vld [vmem:[%s7156_s3 + $0x1a4] ss:$8 sps:$4 sm:$0xff]  }
 0x226   :  { %v6277_v0 = vrot.slane %v1527_v52, %v5684_v18  ;;  %v6280_v25 = vrot.slane %v1526_v54, %v5684_v18  ;;  %v1623_v1 = vrot.slane %v1595_v56, %v5684_v18  ;;  %v6284_v33 = vrot.slane %v1594_v57, %v5684_v18  ;;  %v5291_v52 = vld [vmem:[%s7156_s3 + $0x1b0] ss:$8 sps:$4 sm:$0xff]   ;;  %v5296_v54 = vld [vmem:[%s7156_s3 + $0x1c4] ss:$8 sps:$4 sm:$0xff]   ;;  %v5294_v56 = vld [vmem:[%s7156_s3 + $0x1c0] ss:$8 sps:$4 sm:$0xff]  }
 0x227   :  { %v6287_v53 = vrot.slane %v1639_v58, %v5684_v18  ;;  %v6290_v2 = vrot.slane %v1638_v60, %v5684_v18  ;;  %v6293_v3 = vrot.slane %v1683_v62, %v5684_v18  ;;  %v1682_v27 = vcombine.low %v1591_v47, %v1679_v50  ;;  %v5287_v47 = vld [vmem:[%s7156_s3 + $0x194] ss:$8 sps:$4 sm:$0xff]   ;;  %v5288_v50 = vld [vmem:[%s7156_s3 + $0x1a0] ss:$8 sps:$4 sm:$0xff]   ;;  %v5297_v58 = vld [vmem:[%s7156_s3 + $0x1d0] ss:$8 sps:$4 sm:$0xff]  }
 0x228   :  { %v1557_v34 = vcombine.low %v1541_v23, %v6277_v0  ;;  %v1556_v6 = vcombine.low %v1534_v38, %v6280_v25  ;;  %v1624_v7 = vcombine.low %v6258_v44, %v6284_v33  ;;  %v1625_v31 = vcombine.low %v1609_v42, %v1623_v1  ;;  %v5270_v23 = vld [vmem:[%s7156_s3 + $0x140] ss:$8 sps:$4 sm:$0xff]   ;;  %v5281_v38 = vld [vmem:[%s7156_s3 + $0x174] ss:$8 sps:$4 sm:$0xff]   ;;  %v5279_v42 = vld [vmem:[%s7156_s3 + $0x170] ss:$8 sps:$4 sm:$0xff]  }
 0x229   :  { %v1669_v32 = vcombine.low %v6266_v41, %v6287_v53  ;;  %v1668_v37 = vcombine.low %v6269_v49, %v6290_v2  ;;  %v1713_v5 = vcombine.low %v6274_v63, %v6293_v3  ;;  %v6312_v8 = vrot.slane %v1680_v51, %v5684_v18  ;;  %v5293_v51 = vld [vmem:[%s7156_s3 + $0x1b4] ss:$8 sps:$4 sm:$0xff]   ;;  %v5302_v60 = vld [vmem:[%s7156_s3 + $0x1e4] ss:$8 sps:$4 sm:$0xff]   ;;  %v5300_v62 = vld [vmem:[%s7156_s3 + $0x1e0] ss:$8 sps:$4 sm:$0xff]  }
 0x22a   :  { %2740 = vmatprep.mubr.bf16.mxu1 %v1557_v34  ;;  %v6315_v11 = vrot.slane %v1682_v27, %v5684_v18  ;;  %v1717_v12 = vcombine.high %v1635_v28, %v6233_v61  ;;  %v1716_v13 = vcombine.low %v1635_v28, %v6233_v61  ;;  %v5285_v28 = vld [vmem:[%s7156_s3 + $0x190] ss:$8 sps:$4 sm:$0xff]   ;;  %v5299_v57 = vld [vmem:[%s7156_s3 + $0x1d4] ss:$8 sps:$4 sm:$0xff]   ;;  %v5308_v34 = vld [vmem:[%s7156_s3 + $0x204] ss:$8 sps:$4 sm:$0xff]  }
 0x22b   :  { %2741 = vmatmul.mubr.bf16.vlgmr.msra.gmra.mrb[0].mxu1 %v1556_v6  ;;  %v5305_v1 = vld [vmem:[%s7156_s3 + $0x1f4] ss:$8 sps:$4 sm:$0xff]   ;;  %v5303_v27 = vld [vmem:[%s7156_s3 + $0x1f0] ss:$8 sps:$4 sm:$0xff]   ;;  %v5312_v44 = vld [vmem:[%s7156_s3 + $0x220] ss:$8 sps:$4 sm:$0xff]  }
 0x22c   :  { %2752 = vmatpush1.bf16.msra.mxu1 %v5258_v4  ;;  %2783 = vmatprep.mubr.bf16.mxu1 %v1625_v31  ;;  %v1712_v39 = vcombine.low %v6312_v8, %v6315_v11  ;;  %v6325_v43 = vrot.slane %v1717_v12, %v5684_v18  ;;  %v6328_v17 = vrot.slane %v1716_v13, %v5684_v18  ;;  %v5306_v4 = vld [vmem:[%s7156_s3 + $0x200] ss:$8 sps:$4 sm:$0xff]   ;;  %v5311_v6 = vld [vmem:[%s7156_s3 + $0x214] ss:$8 sps:$4 sm:$0xff]   ;;  %v5309_v31 = vld [vmem:[%s7156_s3 + $0x210] ss:$8 sps:$4 sm:$0xff]  }
 0x22d   :  { %2753 = vmatprep.subr.bf16.mxu1 %v5263_v26  ;;  %v5314_v26 = vld [vmem:[%s7156_s3 + $0x224] ss:$8 sps:$4 sm:$0xff]   ;;  %v5317_v41 = vld [vmem:[%s7156_s3 + $0x234] ss:$8 sps:$4 sm:$0xff]   ;;  %v5315_v33 = vld [vmem:[%s7156_s3 + $0x230] ss:$8 sps:$4 sm:$0xff]  }
 0x22e   :  { %v1733_v20 = vcombine.low %v6277_v0, %v6325_v43  ;;  %v1732_v21 = vcombine.low %v6280_v25, %v6328_v17  ;;  %v5320_v53 = vld [vmem:[%s7156_s3 + $0x244] ss:$8 sps:$4 sm:$0xff]   ;;  %v5321_v12 = vld [vmem:[%s7156_s3 + $0x250] ss:$8 sps:$4 sm:$0xff]   ;;  %v5360_v49 = vld [vmem:[%s7156_s3 + $0x320] ss:$8 sps:$4 sm:$0xff]  }
 0x22f   :  { %v5326_v13 = vld [vmem:[%s7156_s3 + $0x264] ss:$8 sps:$4 sm:$0xff]   ;;  %v5365_v63 = vld [vmem:[%s7156_s3 + $0x334] ss:$8 sps:$4 sm:$0xff]   ;;  %v5363_v2 = vld [vmem:[%s7156_s3 + $0x330] ss:$8 sps:$4 sm:$0xff]  }
 0x230   :  { %2754 = vmatpush1.bf16.msra.mxu1 %v5261_v14  ;;  %v5324_v14 = vld [vmem:[%s7156_s3 + $0x260] ss:$8 sps:$4 sm:$0xff]   ;;  %v5368_v3 = vld [vmem:[%s7156_s3 + $0x344] ss:$8 sps:$4 sm:$0xff]   ;;  %v5413_v0 = vld [vmem:[%s7156_s3 + $0x434] ss:$8 sps:$4 sm:$0xff]  }
 0x231   :  { %2755 = vmatprep.subr.bf16.mxu1 %v5266_v19  ;;  %v5329_v19 = vld [vmem:[%s7156_s3 + $0x274] ss:$8 sps:$4 sm:$0xff]   ;;  %v5408_v8 = vld [vmem:[%s7156_s3 + $0x420] ss:$8 sps:$4 sm:$0xff]   ;;  %v5411_v11 = vld [vmem:[%s7156_s3 + $0x430] ss:$8 sps:$4 sm:$0xff]  }
 0x232   :  { %v5414_v43 = vld [vmem:[%s7156_s3 + $0x440] ss:$8 sps:$4 sm:$0xff]  }
 0x233   :  { %v1896_v25 = vld [vmem:[%s7157_s4] sm:$0x3] }
 0x234   :  { %2756 = vmatpush1.bf16.msra.mxu1 %v5264_v55  ;;  %v5327_v55 = vld [vmem:[%s7156_s3 + $0x270] ss:$8 sps:$4 sm:$0xff]   ;;  %v1901_v17 = vrot.slane %v1896_v25, %v451_v16 }
 0x235   :  { %2757 = vmatprep.subr.bf16.mxu1 %v5269_v9  ;;  %v5332_v9 = vld [vmem:[%s7156_s3 + $0x284] ss:$8 sps:$4 sm:$0xff]  }
 0x238   :  { %2758 = vmatpush1.bf16.msra.mxu1 %v5267_v22  ;;  %v5330_v22 = vld [vmem:[%s7156_s3 + $0x280] ss:$8 sps:$4 sm:$0xff]  }
 0x239   :  { %2759 = vmatprep.subr.bf16.mxu1 %v5272_v59  ;;  %v5335_v59 = vld [vmem:[%s7156_s3 + $0x294] ss:$8 sps:$4 sm:$0xff]  }
 0x23c   :  { %2760 = vmatpush1.bf16.msra.mxu1 %v5270_v23  ;;  %v5333_v23 = vld [vmem:[%s7156_s3 + $0x290] ss:$8 sps:$4 sm:$0xff]  }
 0x23d   :  { %2761 = vmatprep.subr.bf16.mxu1 %v5275_v24  ;;  %v5338_v24 = vld [vmem:[%s7156_s3 + $0x2a4] ss:$8 sps:$4 sm:$0xff]  }
 0x240   :  { %2762 = vmatpush1.bf16.msra.mxu1 %v5273_v29  ;;  %v5336_v29 = vld [vmem:[%s7156_s3 + $0x2a0] ss:$8 sps:$4 sm:$0xff]  }
 0x241   :  { %2763 = vmatprep.subr.bf16.mxu1 %v5278_v30  ;;  %v5341_v30 = vld [vmem:[%s7156_s3 + $0x2b4] ss:$8 sps:$4 sm:$0xff]  }
 0x244   :  { %2764 = vmatpush1.bf16.msra.mxu1 %v5276_v36  ;;  %v5339_v36 = vld [vmem:[%s7156_s3 + $0x2b0] ss:$8 sps:$4 sm:$0xff]  }
 0x245   :  { %2765 = vmatprep.subr.bf16.mxu1 %v5281_v38  ;;  %v5344_v38 = vld [vmem:[%s7156_s3 + $0x2c4] ss:$8 sps:$4 sm:$0xff]  }
 0x248   :  { %2766 = vmatpush1.bf16.msra.mxu1 %v5279_v42  ;;  %v5342_v42 = vld [vmem:[%s7156_s3 + $0x2c0] ss:$8 sps:$4 sm:$0xff]  }
 0x249   :  { %2767 = vmatprep.subr.bf16.mxu1 %v5284_v45  ;;  %v5347_v45 = vld [vmem:[%s7156_s3 + $0x2d4] ss:$8 sps:$4 sm:$0xff]  }
 0x24c   :  { %2768 = vmatpush1.bf16.msra.mxu1 %v5282_v46  ;;  %v5345_v46 = vld [vmem:[%s7156_s3 + $0x2d0] ss:$8 sps:$4 sm:$0xff]  }
 0x24d   :  { %2769 = vmatprep.subr.bf16.mxu1 %v5287_v47  ;;  %v5350_v47 = vld [vmem:[%s7156_s3 + $0x2e4] ss:$8 sps:$4 sm:$0xff]  }
 0x250   :  { %2770 = vmatpush1.bf16.msra.mxu1 %v5285_v28  ;;  %v5348_v28 = vld [vmem:[%s7156_s3 + $0x2e0] ss:$8 sps:$4 sm:$0xff]  }
 0x251   :  { %2771 = vmatprep.subr.bf16.mxu1 %v5290_v48  ;;  %v5353_v48 = vld [vmem:[%s7156_s3 + $0x2f4] ss:$8 sps:$4 sm:$0xff]  }
 0x254   :  { %2772 = vmatpush1.bf16.msra.mxu1 %v5288_v50  ;;  %v5351_v50 = vld [vmem:[%s7156_s3 + $0x2f0] ss:$8 sps:$4 sm:$0xff]  }
 0x255   :  { %2773 = vmatprep.subr.bf16.mxu1 %v5293_v51  ;;  %v5356_v51 = vld [vmem:[%s7156_s3 + $0x304] ss:$8 sps:$4 sm:$0xff]  }
 0x258   :  { %2774 = vmatpush1.bf16.msra.mxu1 %v5291_v52  ;;  %v5354_v52 = vld [vmem:[%s7156_s3 + $0x300] ss:$8 sps:$4 sm:$0xff]  }
 0x259   :  { %2775 = vmatprep.subr.bf16.mxu1 %v5296_v54  ;;  %v5359_v54 = vld [vmem:[%s7156_s3 + $0x314] ss:$8 sps:$4 sm:$0xff]  }
 0x25c   :  { %2776 = vmatpush1.bf16.msra.mxu1 %v5294_v56  ;;  %v5357_v56 = vld [vmem:[%s7156_s3 + $0x310] ss:$8 sps:$4 sm:$0xff]  }
 0x25d   :  { %2777 = vmatprep.subr.bf16.mxu1 %v5299_v57  ;;  %v5362_v57 = vld [vmem:[%s7156_s3 + $0x324] ss:$8 sps:$4 sm:$0xff]  }
 0x260   :  { %2778 = vmatpush1.bf16.msra.mxu1 %v5297_v58  ;;  %v5369_v58 = vld [vmem:[%s7156_s3 + $0x350] ss:$8 sps:$4 sm:$0xff]  }
 0x261   :  { %2779 = vmatprep.subr.bf16.mxu1 %v5302_v60  ;;  %v5374_v60 = vld [vmem:[%s7156_s3 + $0x364] ss:$8 sps:$4 sm:$0xff]  }
 0x264   :  { %2780 = vmatpush1.bf16.msra.mxu1 %v5300_v62  ;;  %v5372_v62 = vld [vmem:[%s7156_s3 + $0x360] ss:$8 sps:$4 sm:$0xff]  }
 0x265   :  { %2781 = vmatprep.subr.bf16.mxu1 %v5305_v1  ;;  %v5377_v1 = vld [vmem:[%s7156_s3 + $0x374] ss:$8 sps:$4 sm:$0xff]  }
 0x268   :  { %2782 = vmatpush1.bf16.msra.mxu1 %v5303_v27  ;;  %v5375_v27 = vld [vmem:[%s7156_s3 + $0x370] ss:$8 sps:$4 sm:$0xff]  }
 0x269   :  { %2794 = vmatprep.subr.bf16.mxu1 %v5308_v34  ;;  %v5380_v34 = vld [vmem:[%s7156_s3 + $0x384] ss:$8 sps:$4 sm:$0xff]  }
 0x26b   :  { %2784 = vmatmul.mubr.bf16.vlgmr.msra.gmra.mrb[0].mxu1 %v1624_v7  ;;  %v5318_v7 = vld [vmem:[%s7156_s3 + $0x240] ss:$8 sps:$4 sm:$0xff]  }
 0x26c   :  { %2795 = vmatpush1.bf16.msra.mxu1 %v5306_v4  ;;  %2826 = vmatprep.mubr.bf16.mxu1 %v1669_v32  ;;  %v5323_v32 = vld [vmem:[%s7156_s3 + $0x254] ss:$8 sps:$4 sm:$0xff]   ;;  %v5378_v4 = vld [vmem:[%s7156_s3 + $0x380] ss:$8 sps:$4 sm:$0xff]  }
 0x26d   :  { %2796 = vmatprep.subr.bf16.mxu1 %v5311_v6  ;;  %v5383_v6 = vld [vmem:[%s7156_s3 + $0x394] ss:$8 sps:$4 sm:$0xff]  }
 0x270   :  { %2797 = vmatpush1.bf16.msra.mxu1 %v5309_v31  ;;  %v5381_v31 = vld [vmem:[%s7156_s3 + $0x390] ss:$8 sps:$4 sm:$0xff]  }
 0x271   :  { %2798 = vmatprep.subr.bf16.mxu1 %v5314_v26  ;;  %v5386_v26 = vld [vmem:[%s7156_s3 + $0x3a4] ss:$8 sps:$4 sm:$0xff]  }
 0x274   :  { %2799 = vmatpush1.bf16.msra.mxu1 %v5312_v44  ;;  %v5384_v44 = vld [vmem:[%s7156_s3 + $0x3a0] ss:$8 sps:$4 sm:$0xff]  }
 0x275   :  { %2800 = vmatprep.subr.bf16.mxu1 %v5317_v41  ;;  %v5389_v41 = vld [vmem:[%s7156_s3 + $0x3b4] ss:$8 sps:$4 sm:$0xff]  }
 0x278   :  { %2801 = vmatpush1.bf16.msra.mxu1 %v5315_v33  ;;  %v5387_v33 = vld [vmem:[%s7156_s3 + $0x3b0] ss:$8 sps:$4 sm:$0xff]  }
 0x279   :  { %2802 = vmatprep.subr.bf16.mxu1 %v5320_v53  ;;  %v5392_v53 = vld [vmem:[%s7156_s3 + $0x3c4] ss:$8 sps:$4 sm:$0xff]  }
 0x27c   :  { %2803 = vmatpush1.bf16.msra.mxu1 %v5318_v7  ;;  %v5390_v7 = vld [vmem:[%s7156_s3 + $0x3c0] ss:$8 sps:$4 sm:$0xff]  }
 0x27d   :  { %2804 = vmatprep.subr.bf16.mxu1 %v5323_v32  ;;  %v5395_v32 = vld [vmem:[%s7156_s3 + $0x3d4] ss:$8 sps:$4 sm:$0xff]  }
 0x280   :  { %2805 = vmatpush1.bf16.msra.mxu1 %v5321_v12  ;;  %v5393_v12 = vld [vmem:[%s7156_s3 + $0x3d0] ss:$8 sps:$4 sm:$0xff]  }
 0x281   :  { %2806 = vmatprep.subr.bf16.mxu1 %v5326_v13  ;;  %v5398_v13 = vld [vmem:[%s7156_s3 + $0x3e4] ss:$8 sps:$4 sm:$0xff]  }
 0x284   :  { %2807 = vmatpush1.bf16.msra.mxu1 %v5324_v14  ;;  %v5396_v14 = vld [vmem:[%s7156_s3 + $0x3e0] ss:$8 sps:$4 sm:$0xff]  }
 0x285   :  { %2808 = vmatprep.subr.bf16.mxu1 %v5329_v19  ;;  %v5401_v19 = vld [vmem:[%s7156_s3 + $0x3f4] ss:$8 sps:$4 sm:$0xff]  }
 0x288   :  { %2809 = vmatpush1.bf16.msra.mxu1 %v5327_v55  ;;  %v5399_v55 = vld [vmem:[%s7156_s3 + $0x3f0] ss:$8 sps:$4 sm:$0xff]  }
 0x289   :  { %2810 = vmatprep.subr.bf16.mxu1 %v5332_v9  ;;  %v5404_v9 = vld [vmem:[%s7156_s3 + $0x404] ss:$8 sps:$4 sm:$0xff]  }
 0x28c   :  { %2811 = vmatpush1.bf16.msra.mxu1 %v5330_v22  ;;  %v5402_v22 = vld [vmem:[%s7156_s3 + $0x400] ss:$8 sps:$4 sm:$0xff]  }
 0x28d   :  { %2812 = vmatprep.subr.bf16.mxu1 %v5335_v59  ;;  %v5407_v59 = vld [vmem:[%s7156_s3 + $0x414] ss:$8 sps:$4 sm:$0xff]  }
 0x290   :  { %2813 = vmatpush1.bf16.msra.mxu1 %v5333_v23  ;;  %v5405_v23 = vld [vmem:[%s7156_s3 + $0x410] ss:$8 sps:$4 sm:$0xff]  }
 0x291   :  { %2814 = vmatprep.subr.bf16.mxu1 %v5338_v24  ;;  %v5410_v24 = vld [vmem:[%s7156_s3 + $0x424] ss:$8 sps:$4 sm:$0xff]  }
 0x294   :  { %2815 = vmatpush1.bf16.msra.mxu1 %v5336_v29  ;;  %v5417_v29 = vld [vmem:[%s7156_s3 + $0x450] ss:$8 sps:$4 sm:$0xff]  }
 0x295   :  { %2816 = vmatprep.subr.bf16.mxu1 %v5341_v30  ;;  %v5422_v30 = vld [vmem:[%s7156_s3 + $0x464] ss:$8 sps:$4 sm:$0xff]  }
 0x298   :  { %2817 = vmatpush1.bf16.msra.mxu1 %v5339_v36  ;;  %v5420_v36 = vld [vmem:[%s7156_s3 + $0x460] ss:$8 sps:$4 sm:$0xff]  }
 0x299   :  { %2818 = vmatprep.subr.bf16.mxu1 %v5344_v38  ;;  %v5425_v38 = vld [vmem:[%s7156_s3 + $0x474] ss:$8 sps:$4 sm:$0xff]  }
 0x29c   :  { %2819 = vmatpush1.bf16.msra.mxu1 %v5342_v42  ;;  %v5423_v42 = vld [vmem:[%s7156_s3 + $0x470] ss:$8 sps:$4 sm:$0xff]  }
 0x29d   :  { %2820 = vmatprep.subr.bf16.mxu1 %v5347_v45  ;;  %v5428_v45 = vld [vmem:[%s7156_s3 + $0x484] ss:$8 sps:$4 sm:$0xff]  }
 0x2a0   :  { %2821 = vmatpush1.bf16.msra.mxu1 %v5345_v46  ;;  %v5426_v46 = vld [vmem:[%s7156_s3 + $0x480] ss:$8 sps:$4 sm:$0xff]  }
 0x2a1   :  { %2822 = vmatprep.subr.bf16.mxu1 %v5350_v47  ;;  %v5431_v47 = vld [vmem:[%s7156_s3 + $0x494] ss:$8 sps:$4 sm:$0xff]  }
 0x2a4   :  { %2823 = vmatpush1.bf16.msra.mxu1 %v5348_v28  ;;  %v5429_v28 = vld [vmem:[%s7156_s3 + $0x490] ss:$8 sps:$4 sm:$0xff]  }
 0x2a5   :  { %2824 = vmatprep.subr.bf16.mxu1 %v5353_v48  ;;  %v5434_v48 = vld [vmem:[%s7156_s3 + $0x4a4] ss:$8 sps:$4 sm:$0xff]  }
 0x2a8   :  { %2825 = vmatpush1.bf16.msra.mxu1 %v5351_v50  ;;  %v5432_v50 = vld [vmem:[%s7156_s3 + $0x4a0] ss:$8 sps:$4 sm:$0xff]  }
 0x2a9   :  { %2837 = vmatprep.subr.bf16.mxu1 %v5356_v51  ;;  %v5437_v51 = vld [vmem:[%s7156_s3 + $0x4b4] ss:$8 sps:$4 sm:$0xff]  }
 0x2ab   :  { %2827 = vmatmul.mubr.bf16.vlgmr.msra.gmra.mrb[0].mxu1 %v1668_v37  ;;  %v5366_v37 = vld [vmem:[%s7156_s3 + $0x340] ss:$8 sps:$4 sm:$0xff]  }
 0x2ac   :  { %2838 = vmatpush1.bf16.msra.mxu1 %v5354_v52  ;;  %2869 = vmatprep.mubr.bf16.mxu1 %v1713_v5  ;;  %v5371_v5 = vld [vmem:[%s7156_s3 + $0x354] ss:$8 sps:$4 sm:$0xff]   ;;  %v5435_v52 = vld [vmem:[%s7156_s3 + $0x4b0] ss:$8 sps:$4 sm:$0xff]  }
 0x2ad   :  { %2839 = vmatprep.subr.bf16.mxu1 %v5359_v54  ;;  %v5440_v54 = vld [vmem:[%s7156_s3 + $0x4c4] ss:$8 sps:$4 sm:$0xff]  }
 0x2b0   :  { %2840 = vmatpush1.bf16.msra.mxu1 %v5357_v56  ;;  %v5438_v56 = vld [vmem:[%s7156_s3 + $0x4c0] ss:$8 sps:$4 sm:$0xff]  }
 0x2b1   :  { %2841 = vmatprep.subr.bf16.mxu1 %v5362_v57  ;;  %v5443_v57 = vld [vmem:[%s7156_s3 + $0x4d4] ss:$8 sps:$4 sm:$0xff]  }
 0x2b4   :  { %2842 = vmatpush1.bf16.msra.mxu1 %v5360_v49  ;;  %v5441_v49 = vld [vmem:[%s7156_s3 + $0x4d0] ss:$8 sps:$4 sm:$0xff]  }
 0x2b5   :  { %2843 = vmatprep.subr.bf16.mxu1 %v5365_v63  ;;  %v5446_v63 = vld [vmem:[%s7156_s3 + $0x4e4] ss:$8 sps:$4 sm:$0xff]  }
 0x2b8   :  { %2844 = vmatpush1.bf16.msra.mxu1 %v5363_v2  ;;  %v5444_v2 = vld [vmem:[%s7156_s3 + $0x4e0] ss:$8 sps:$4 sm:$0xff]  }
 0x2b9   :  { %2845 = vmatprep.subr.bf16.mxu1 %v5368_v3  ;;  %v5449_v3 = vld [vmem:[%s7156_s3 + $0x4f4] ss:$8 sps:$4 sm:$0xff]  }
 0x2bc   :  { %2846 = vmatpush1.bf16.msra.mxu1 %v5366_v37  ;;  %v5447_v37 = vld [vmem:[%s7156_s3 + $0x4f0] ss:$8 sps:$4 sm:$0xff]  }
 0x2bd   :  { %2847 = vmatprep.subr.bf16.mxu1 %v5371_v5  ;;  %v5450_v5 = vld [vmem:[%s7158_s5 + $0x40] sm:$0xff]  }
 0x2be   :  { %4886 = vmatprep.subr.bf16.mxu0 %v5450_v5 }
 0x2c0   :  { %2848 = vmatpush1.bf16.msra.mxu1 %v5369_v58  ;;  %v5451_v58 = vld [vmem:[%s7158_s5] sm:$0xff]  }
 0x2c1   :  { %2849 = vmatprep.subr.bf16.mxu1 %v5374_v60  ;;  %v5452_v60 = vld [vmem:[%s7158_s5 + $0x48] sm:$0xff]   ;;  %4887 = vmatpush3.bf16.msra.mxu0 %v5451_v58 }
 0x2c2   :  { %4888 = vmatprep.subr.bf16.mxu0 %v5452_v60 }
 0x2c4   :  { %2850 = vmatpush1.bf16.msra.mxu1 %v5372_v62 }
 0x2c5   :  { %2851 = vmatprep.subr.bf16.mxu1 %v5377_v1 }
 0x2c8   :  { %2852 = vmatpush1.bf16.msra.mxu1 %v5375_v27 }
 0x2c9   :  { %2853 = vmatprep.subr.bf16.mxu1 %v5380_v34 }
 0x2cc   :  { %2854 = vmatpush1.bf16.msra.mxu1 %v5378_v4 }
 0x2cd   :  { %2855 = vmatprep.subr.bf16.mxu1 %v5383_v6 }
 0x2d0   :  { %2856 = vmatpush1.bf16.msra.mxu1 %v5381_v31 }
 0x2d1   :  { %2857 = vmatprep.subr.bf16.mxu1 %v5386_v26 }
 0x2d4   :  { %2858 = vmatpush1.bf16.msra.mxu1 %v5384_v44 }
 0x2d5   :  { %2859 = vmatprep.subr.bf16.mxu1 %v5389_v41 }
 0x2d8   :  { %2860 = vmatpush1.bf16.msra.mxu1 %v5387_v33 }
 0x2d9   :  { %2861 = vmatprep.subr.bf16.mxu1 %v5392_v53 }
 0x2dc   :  { %2862 = vmatpush1.bf16.msra.mxu1 %v5390_v7 }
 0x2dd   :  { %2863 = vmatprep.subr.bf16.mxu1 %v5395_v32 }
 0x2e0   :  { %2864 = vmatpush1.bf16.msra.mxu1 %v5393_v12 }
 0x2e1   :  { %2865 = vmatprep.subr.bf16.mxu1 %v5398_v13 }
 0x2e4   :  { %2866 = vmatpush1.bf16.msra.mxu1 %v5396_v14 }
 0x2e5   :  { %2867 = vmatprep.subr.bf16.mxu1 %v5401_v19 }
 0x2e8   :  { %2868 = vmatpush1.bf16.msra.mxu1 %v5399_v55 }
 0x2e9   :  { %2880 = vmatprep.subr.bf16.mxu1 %v5404_v9 }
 0x2eb   :  { %2870 = vmatmul.mubr.bf16.vlgmr.msra.gmra.mrb[0].mxu1 %v1712_v39  ;;  %v5416_v39 = vld [vmem:[%s7156_s3 + $0x444] ss:$8 sps:$4 sm:$0xff]  }
 0x2ec   :  { %2881 = vmatpush1.bf16.msra.mxu1 %v5402_v22  ;;  %2912 = vmatprep.mubr.bf16.mxu1 %v1733_v20  ;;  %v5419_v20 = vld [vmem:[%s7156_s3 + $0x454] ss:$8 sps:$4 sm:$0xff]  }
 0x2ed   :  { %2882 = vmatprep.subr.bf16.mxu1 %v5407_v59 }
 0x2f0   :  { %2883 = vmatpush1.bf16.msra.mxu1 %v5405_v23 }
 0x2f1   :  { %2884 = vmatprep.subr.bf16.mxu1 %v5410_v24  ;;  %v5453_v24 = vld [vmem:[%s7158_s5 + $0x8] sm:$0xff]  }
 0x2f2   :  { %4889 = vmatpush3.bf16.msra.mxu0 %v5453_v24 }
 0x2f4   :  { %2885 = vmatpush1.bf16.msra.mxu1 %v5408_v8 }
 0x2f5   :  { %2886 = vmatprep.subr.bf16.mxu1 %v5413_v0 }
 0x2f8   :  { %2887 = vmatpush1.bf16.msra.mxu1 %v5411_v11 }
 0x2f9   :  { %2888 = vmatprep.subr.bf16.mxu1 %v5416_v39  ;;  %v5454_v39 = vld [vmem:[%s7158_s5 + $0x50] sm:$0xff]  }
 0x2fa   :  { %4890 = vmatprep.subr.bf16.mxu0 %v5454_v39 }
 0x2fc   :  { %2889 = vmatpush1.bf16.msra.mxu1 %v5414_v43 }
 0x2fd   :  { %2890 = vmatprep.subr.bf16.mxu1 %v5419_v20  ;;  %v5455_v20 = vld [vmem:[%s7158_s5 + $0x10] sm:$0xff]  }
 0x2fe   :  { %4891 = vmatpush3.bf16.msra.mxu0 %v5455_v20  ;;  %v5469_v20 = vld [vmem:[%s7158_s5 + $0x88] sm:$0xff]  }
 0x300   :  { %2891 = vmatpush1.bf16.msra.mxu1 %v5417_v29 }
 0x301   :  { %2892 = vmatprep.subr.bf16.mxu1 %v5422_v30 }
 0x304   :  { %2893 = vmatpush1.bf16.msra.mxu1 %v5420_v36  ;;  %v5456_v36 = vld [vmem:[%s7158_s5 + $0x58] sm:$0xff]  }
 0x305   :  { %2894 = vmatprep.subr.bf16.mxu1 %v5425_v38  ;;  %4892 = vmatprep.subr.bf16.mxu0 %v5456_v36  ;;  %v5471_v36 = vld [vmem:[%s7158_s5 + $0x90] sm:$0xff]  }
 0x308   :  { %2895 = vmatpush1.bf16.msra.mxu1 %v5423_v42 }
 0x309   :  { %2896 = vmatprep.subr.bf16.mxu1 %v5428_v45  ;;  %v5457_v45 = vld [vmem:[%s7158_s5 + $0x18] sm:$0xff]  }
 0x30a   :  { %4893 = vmatpush3.bf16.msra.mxu0 %v5457_v45  ;;  %v5473_v45 = vld [vmem:[%s7158_s5 + $0x98] sm:$0xff]  }
 0x30c   :  { %2897 = vmatpush1.bf16.msra.mxu1 %v5426_v46  ;;  %v5458_v46 = vld [vmem:[%s7158_s5 + $0x60] sm:$0xff]  }
 0x30d   :  { %2898 = vmatprep.subr.bf16.mxu1 %v5431_v47  ;;  %v5459_v47 = vld [vmem:[%s7158_s5 + $0x20] sm:$0xff]   ;;  %4894 = vmatprep.subr.bf16.mxu0 %v5458_v46 }
 0x30e   :  { %4895 = vmatpush3.bf16.msra.mxu0 %v5459_v47  ;;  %v5474_v46 = vld [vmem:[%s7158_s5 + $0xe0] sm:$0xff]  }
 0x310   :  { %2899 = vmatpush1.bf16.msra.mxu1 %v5429_v28  ;;  %v5460_v28 = vld [vmem:[%s7158_s5 + $0x68] sm:$0xff]  }
 0x311   :  { %2900 = vmatprep.subr.bf16.mxu1 %v5434_v48  ;;  %v5461_v48 = vld [vmem:[%s7158_s5 + $0x28] sm:$0xff]   ;;  %4896 = vmatprep.subr.bf16.mxu0 %v5460_v28  ;;  %v5475_v28 = vld [vmem:[%s7158_s5 + $0xa0] sm:$0xff]  }
 0x312   :  { %4897 = vmatpush3.bf16.msra.mxu0 %v5461_v48  ;;  %v5476_v48 = vld [vmem:[%s7158_s5 + $0xe8] sm:$0xff]  }
 0x314   :  { %2901 = vmatpush1.bf16.msra.mxu1 %v5432_v50  ;;  %v5462_v50 = vld [vmem:[%s7158_s5 + $0x70] sm:$0xff]  }
 0x315   :  { %2902 = vmatprep.subr.bf16.mxu1 %v5437_v51  ;;  %v5463_v51 = vld [vmem:[%s7158_s5 + $0x30] sm:$0xff]   ;;  %4898 = vmatprep.subr.bf16.mxu0 %v5462_v50 }
 0x316   :  { %4899 = vmatpush3.bf16.msra.mxu0 %v5463_v51  ;;  %v5477_v51 = vld [vmem:[%s7158_s5 + $0xa8] sm:$0xff]  }
 0x318   :  { %2903 = vmatpush1.bf16.msra.mxu1 %v5435_v52  ;;  %v5464_v52 = vld [vmem:[%s7158_s5 + $0x78] sm:$0xff]  }
 0x319   :  { %2904 = vmatprep.subr.bf16.mxu1 %v5440_v54  ;;  %v5465_v54 = vld [vmem:[%s7158_s5 + $0x38] sm:$0xff]   ;;  %4900 = vmatprep.subr.bf16.mxu0 %v5464_v52  ;;  %v5478_v52 = vld [vmem:[%s7158_s5 + $0xf0] sm:$0xff]  }
 0x31a   :  { %4901 = vmatpush3.bf16.msra.mxu0 %v5465_v54 }
 0x31c   :  { %2905 = vmatpush1.bf16.msra.mxu1 %v5438_v56  ;;  %v5466_v56 = vld [vmem:[%s7158_s5 + $0xc0] sm:$0xff]  }
 0x31d   :  { %2906 = vmatprep.subr.bf16.mxu1 %v5443_v57  ;;  %4908 = vmatprep.subr.bf16.mxu0 %v5466_v56  ;;  %v5479_v56 = vld [vmem:[%s7158_s5 + $0xb0] sm:$0xff]  }
 0x320   :  { %2907 = vmatpush1.bf16.msra.mxu1 %v5441_v49 }
 0x321   :  { %2908 = vmatprep.subr.bf16.mxu1 %v5446_v63 }
 0x324   :  { %2909 = vmatpush1.bf16.msra.mxu1 %v5444_v2 }
 0x325   :  { %2910 = vmatprep.subr.bf16.mxu1 %v5449_v3 }
 0x328   :  { %2911 = vmatpush1.bf16.msra.mxu1 %v5447_v37 }
 0x32b   :  { %2913 = vmatmul.mubr.bf16.vlgmr.msra.gmra.mrb[0].mxu1 %v1732_v21  ;;  %v1905_v21 = vrot.slane %v1896_v25, %v455_v40 }
 0x3fe   :  { %v2914_v62 = vpop.f32.mrb[0].mxu1 }
 0x3ff   :  { %v5048_v1 = vadd.f32 %v2914_v62, %v1901_v17  ;;  %v2916_v27 = vpop.f32.mrb[1].mxu1 }
 0x400   :  { %v5049_v34 = vadd.f32 %v2916_v27, %v1905_v21  ;;  %v2918_v4 = vpop.f32.mrb[2].mxu1 }
 0x401   :  { %v2923_v6 = vmax.f32 %v5048_v1, 0.0  ;;  %v5050_v31 = vadd.f32 %v2918_v4, %v1901_v17  ;;  %v2920_v26 = vpop.f32.mrb[3].mxu1 }
 0x402   :  { %v2924_v44 = vmax.f32 %v5049_v34, 0.0  ;;  %v5051_v41 = vadd.f32 %v2920_v26, %v1905_v21 }
 0x403   :  { %v2925_v33 = vmax.f32 %v5050_v31, 0.0 }
 0x404   :  { %v2931_v53 = vcombine.low %v2923_v6, %v2924_v44  ;;  %v2932_v7 = vcombine.high %v2923_v6, %v2924_v44  ;;  %v2926_v32 = vmax.f32 %v5051_v41, 0.0 }
 0x406   :  { %v2939_v12 = vrot.slane %v2931_v53, %v6092_v35  ;;  %v2946_v16 = vrot.slane %v2932_v7, %v6092_v35  ;;  %v2949_v15 = vcombine.low %v2925_v33, %v2926_v32  ;;  %v2950_v40 = vcombine.high %v2925_v33, %v2926_v32 }
 0x408   :  { %v2947_v13 = vcombine.high %v2939_v12, %v2939_v12  ;;  %v2948_v14 = vcombine.high %v2946_v16, %v2946_v16  ;;  %v2957_v19 = vrot.slane %v2949_v15, %v6092_v35  ;;  %v2964_v55 = vrot.slane %v2950_v40, %v6092_v35 }
 0x40a   :  { %v2975_v9 = vmax.f32 %v2939_v12, %v2947_v13  ;;  %v2976_v22 = vmax.f32 %v2946_v16, %v2948_v14  ;;  %v2965_v59 = vcombine.high %v2957_v19, %v2957_v19  ;;  %v2966_v23 = vcombine.high %v2964_v55, %v2964_v55 }
 0x40c   :  { %v2977_v8 = vmax.f32 %v2957_v19, %v2965_v59  ;;  %v6750_v0 = vmax.f32 %v2964_v55, %v2966_v23  ;;  %v2983_v11 = vcombine.low %v2975_v9, %v2976_v22 }
 0x40e   :  { %v2984_v43 = vcombine.low %v2977_v8, %v6750_v0  ;;  %v2991_v29 = vrot.slane %v2983_v11, %v6092_v35  ;;  %v5467_v11 = vld [vmem:[%s7158_s5 + $0x80] sm:$0xff]  }
 0x410   :  { %v2998_v30 = vrot.slane %v2984_v43, %v6092_v35 }
 0x412   :  { %v3000_v38 = vcombine.high %v2991_v29, %v2998_v30  ;;  %v2999_v42 = vcombine.low %v2991_v29, %v2998_v30  ;;  %v5470_v29 = vld [vmem:[%s7158_s5 + $0xd0] sm:$0xff]  }
 0x414   :  { %3003 = vrot.lane.b32.xlu1 %v3000_v38, %s5590_s1  ;;  %3001 = vrot.lane.b32.xlu0 %v2999_v42, %s5590_s1  ;;  %v5472_v38 = vld [vmem:[%s7158_s5 + $0xd8] sm:$0xff]   ;;  %s5591_s1 = smov [#allocation2]  }
 0x415   :  { %s4512_s10 = sshll.u32 %s5591_s1, 4  ;;  %s4513_s10 = int_to_ptr.vmem [resolvable:$true] %s4512_s10 }
 0x416   :  { %s5562_s11 = scalar_lea.vmem %s4513_s10, 32  ;;  %p5567_p1 = scmp.lt.s32.totalorder %s4513_s10, %s4513_s10 }
 0x417   :  { %p5563_p0 = scmp.ne.s32.totalorder %s4513_s10, %s5562_s11  ;;  %p5568_p2 = scmp.lt.s32.totalorder %s5562_s11, %s5562_s11 }
 0x419   :  { %p5569_p3 = por %p5568_p2, %p5567_p1 }
 0x41b   :  { %p5570_p4 = pnand %p5569_p3, %p5563_p0 }
 0x486   :  { %v3004_v57 = vpop.permute.xlu1 %3003  ;;  %v3002_v49 = vpop.permute.xlu0 %3001 }
 0x487   :  { %v3006_v63 = vsel %vm3005_vm1, %v3002_v49, %v3004_v57  ;;  %v3009_v2 = vsel %vm3005_vm1, %v3004_v57, %v3002_v49  ;;  %v5480_v57 = vld [vmem:[%s7158_s5 + $0xf8] sm:$0xff]  }
 0x488   :  { %v3011_v3 = vcombine.low %v3006_v63, %v3009_v2  ;;  %v3012_v37 = vcombine.high %v3006_v63, %v3009_v2  ;;  %v5481_v63 = vld [vmem:[%s7158_s5 + $0xb8] sm:$0xff]  }
 0x48a   :  { %v3019_v5 = vrot.slane %v3011_v3, %v6092_v35  ;;  %v3026_v58 = vrot.slane %v3012_v37, %v6092_v35  ;;  %v5482_v3 = vld [vmem:[%s7158_s5 + $0x140] sm:$0xff]  }
 0x48c   :  { %v3027_v60 = vcombine.high %v3019_v5, %v3019_v5  ;;  %v3033_v25 = vmax.f32 %v2975_v9, %v3019_v5  ;;  %v3035_v17 = vmax.f32 %v2977_v8, %v3026_v58  ;;  %v3028_v15 = vcombine.high %v3026_v58, %v3026_v58  ;;  %v5483_v5 = vld [vmem:[%s7158_s5 + $0x100] sm:$0xff]  }
 0x48e   :  { %v3034_v21 = vmax.f32 %v2976_v22, %v3027_v60  ;;  %v3047_v62 = vrot.slane %v3033_v25, %v6092_v35  ;;  %v3063_v1 = vrot.slane %v3035_v17, %v6092_v35  ;;  %v3036_v9 = vmax.f32 %v6750_v0, %v3028_v15  ;;  %v5468_v0 = vld [vmem:[%s7158_s5 + $0xc8] sm:$0xff]  }
 0x48f   :  { %v5484_v60 = vld [vmem:[%s7158_s5 + $0x148] sm:$0xff]  }
 0x490   :  { %v3048_v27 = vcombine.high %v3047_v62, %v3047_v62  ;;  %v3055_v34 = vrot.slane %v3034_v21, %v6092_v35  ;;  %v3064_v4 = vcombine.high %v3063_v1, %v3063_v1  ;;  %v3071_v39 = vrot.slane %v3036_v9, %v6092_v35  ;;  %v5485_v17 = vld [vmem:[%s7158_s5 + $0x108] sm:$0xff]   ;;  %v5486_v21 = vld [vmem:[%s7158_s5 + $0x150] sm:$0xff]  }
 0x491   :  { %v5503_v9 = vld [vmem:[%s7158_s5 + $0x190] sm:$0xff]  }
 0x492   :  { %v3056_v6 = vcombine.high %v3055_v34, %v3055_v34  ;;  %v4768_v31 = vpack.c.bf16 %v3048_v27, %v3047_v62  ;;  %v4770_v26 = vpack.c.bf16 %v3064_v4, %v3063_v1  ;;  %v3072_v30 = vcombine.high %v3071_v39, %v3071_v39  ;;  %v5487_v62 = vld [vmem:[%s7158_s5 + $0x110] sm:$0xff]   ;;  %v5488_v1 = vld [vmem:[%s7158_s5 + $0x158] sm:$0xff]   ;;  %v5491_v4 = vld [vmem:[%s7158_s5 + $0x120] sm:$0xff]  }
 0x493   :  { %v5489_v27 = vld [vmem:[%s7158_s5 + $0x118] sm:$0xff]  }
 0x494   :  { %v3100_v44 = vrot.slane %v4768_v31, %v5684_v18  ;;  %v4769_v41 = vpack.c.bf16 %v3056_v6, %v3055_v34  ;;  %v3132_v33 = vrot.slane %v4770_v26, %v5684_v18  ;;  %v4771_v42 = vpack.c.bf16 %v3072_v30, %v3071_v39  ;;  %v5490_v34 = vld [vmem:[%s7158_s5 + $0x160] sm:$0xff]   ;;  %v5492_v6 = vld [vmem:[%s7158_s5 + $0x168] sm:$0xff]   ;;  %v5494_v26 = vld [vmem:[%s7158_s5 + $0x170] sm:$0xff]  }
 0x495   :  { %v5493_v31 = vld [vmem:[%s7158_s5 + $0x128] sm:$0xff]   ;;  %v5511_v39 = vld [vmem:[%s7158_s5 + $0x1b0] sm:$0xff]   ;;  %v5514_v30 = vld [vmem:[%s7158_s5 + $0x240] sm:$0xff]  }
 0x496   :  { %v3107_v53 = vrot.slane %v3100_v44, %v5684_v18  ;;  %v3115_v7 = vrot.slane %v4769_v41, %v5684_v18  ;;  %v3139_v12 = vrot.slane %v3132_v33, %v5684_v18  ;;  %v3149_v47 = vrot.slane %v4771_v42, %v5684_v18  ;;  %v5495_v41 = vld [vmem:[%s7158_s5 + $0x130] sm:$0xff]   ;;  %v5496_v33 = vld [vmem:[%s7158_s5 + $0x178] sm:$0xff]  }
 0x498   :  { %v3122_v32 = vrot.slane %v3115_v7, %v5684_v18  ;;  %v3183_v16 = vcombine.low %v6209_v10, %v3107_v53  ;;  %v3156_v50 = vrot.slane %v3149_v47, %v5684_v18  ;;  %v5497_v7 = vld [vmem:[%s7158_s5 + $0x138] sm:$0xff]   ;;  %v5518_v47 = vld [vmem:[%s7158_s5 + $0x250] sm:$0xff]  }
 0x49a   :  { %v3157_v40 = vcombine.low %v3107_v53, %v3122_v32  ;;  %v3184_v13 = vcombine.low %v3122_v32, %v3139_v12  ;;  %v3191_v19 = vrot.slane %v3183_v16, %v5684_v18  ;;  %v3217_v54 = vcombine.low %v3139_v12, %v3156_v50  ;;  %v5498_v32 = vld [vmem:[%s7158_s5 + $0x1c0] sm:$0xff]  }
 0x49b   :  { %v3243_v44 = vcombine.low %v3156_v50, %v6209_v10  ;;  %v5499_v16 = vld [vmem:[%s7158_s5 + $0x180] sm:$0xff]   ;;  %v5521_v50 = vld [vmem:[%s7158_s5 + $0x218] sm:$0xff]  }
 0x49c   :  { %v6807_v14 = vrot.slane %v3157_v40, %v5684_v18  ;;  %v6811_v55 = vrot.slane %v3184_v13, %v5684_v18  ;;  %v6868_v49 = vrot.slane %v3217_v54, %v5684_v18  ;;  %v5500_v40 = vld [vmem:[%s7158_s5 + $0x1c8] sm:$0xff]  }
 0x49d   :  { %v3250_v53 = vrot.slane %v3243_v44, %v5684_v18  ;;  %v5524_v54 = vld [vmem:[%s7158_s5 + $0x268] sm:$0xff]   ;;  %v5546_v44 = vld [vmem:[%s7160_s7 + $0x60] sm:$0xff]  }
 0x49e   :  { %v3166_v22 = vcombine.high %v6233_v61, %v6807_v14  ;;  %v3165_v59 = vcombine.low %v6233_v61, %v6807_v14  ;;  %v3200_v23 = vcombine.high %v3191_v19, %v6811_v55  ;;  %v3199_v2 = vcombine.low %v3191_v19, %v6811_v55  ;;  %v5502_v19 = vld [vmem:[%s7158_s5 + $0x1d0] sm:$0xff]  }
 0x49f   :  { %v3226_v37 = vcombine.high %v6807_v14, %v6868_v49  ;;  %v3225_v10 = vcombine.low %v6807_v14, %v6868_v49  ;;  %v3252_v12 = vcombine.high %v6811_v55, %v3250_v53  ;;  %v5501_v14 = vld [vmem:[%s7158_s5 + $0x188] sm:$0xff]  }
 0x4a0   :  { %v3180_v24 = vrot.slane %v3166_v22, %v5684_v18  ;;  %v3173_v8 = vrot.slane %v3165_v59, %v5684_v18  ;;  %v3214_v43 = vrot.slane %v3200_v23, %v5684_v18  ;;  %v3207_v58 = vrot.slane %v3199_v2, %v5684_v18  ;;  %v5504_v22 = vld [vmem:[%s7158_s5 + $0x1d8] sm:$0xff]   ;;  %v5506_v23 = vld [vmem:[%s7158_s5 + $0x1e0] sm:$0xff]  }
 0x4a1   :  { %v3240_v25 = vrot.slane %v3226_v37, %v5684_v18  ;;  %v3233_v15 = vrot.slane %v3225_v10, %v5684_v18  ;;  %v3266_v13 = vrot.slane %v3252_v12, %v5684_v18  ;;  %v5505_v59 = vld [vmem:[%s7158_s5 + $0x198] sm:$0xff]   ;;  %v3269_v37 = vcombine.low %v6868_v49, %v6233_v61  ;;  %v5548_v12 = vld [vmem:[%s7160_s7 + $0xe0] sm:$0xff]  }
 0x4a2   :  { %3966 = vmatprep.mubr.bf16.mxu0 %v3180_v24  ;;  %v5507_v24 = vld [vmem:[%s7158_s5 + $0x1a0] sm:$0xff]   ;;  %v5528_v2 = vld [vmem:[%s7158_s5 + $0x278] sm:$0xff]  }
 0x4a3   :  { %3967 = vmatmul.mubr.bf16.vlgmr.msra.gmra.mrb[8].mxu0 %v3173_v8  ;;  %v5508_v8 = vld [vmem:[%s7158_s5 + $0x1e8] sm:$0xff]  }
 0x4a4   :  { %4909 = vmatpush3.bf16.msra.mxu0 %v5467_v11  ;;  %4006 = vmatprep.mubr.bf16.mxu0 %v3214_v43  ;;  %v5509_v11 = vld [vmem:[%s7158_s5 + $0x1a8] sm:$0xff]   ;;  %v5512_v43 = vld [vmem:[%s7158_s5 + $0x1f8] sm:$0xff]  }
 0x4a5   :  { %4910 = vmatprep.subr.bf16.mxu0 %v5468_v0  ;;  %v5510_v0 = vld [vmem:[%s7158_s5 + $0x1f0] sm:$0xff]  }
 0x4a8   :  { %4911 = vmatpush3.bf16.msra.mxu0 %v5469_v20  ;;  %v5513_v20 = vld [vmem:[%s7158_s5 + $0x1b8] sm:$0xff]  }
 0x4a9   :  { %4912 = vmatprep.subr.bf16.mxu0 %v5470_v29  ;;  %v3251_v29 = vcombine.low %v6811_v55, %v3250_v53 }
 0x4ab   :  { %v3259_v42 = vrot.slane %v3251_v29, %v5684_v18 }
 0x4ac   :  { %4913 = vmatpush3.bf16.msra.mxu0 %v5471_v36  ;;  %v3270_v36 = vcombine.high %v6868_v49, %v6233_v61  ;;  %v5533_v61 = vld [vmem:[%s7160_s7 + $0x80] sm:$0xff]   ;;  %v5536_v49 = vld [vmem:[%s7160_s7 + $0xc8] sm:$0xff]  }
 0x4ad   :  { %4914 = vmatprep.subr.bf16.mxu0 %v5472_v38  ;;  %v5515_v38 = vld [vmem:[%s7158_s5 + $0x200] sm:$0xff]  }
 0x4ae   :  { %v3284_v55 = vrot.slane %v3270_v36, %v5684_v18 }
 0x4b0   :  { %4915 = vmatpush3.bf16.msra.mxu0 %v5473_v45  ;;  %v5516_v45 = vld [vmem:[%s7158_s5 + $0x248] sm:$0xff]  }
 0x4b1   :  { %4916 = vmatprep.subr.bf16.mxu0 %v5474_v46  ;;  %v5517_v46 = vld [vmem:[%s7158_s5 + $0x208] sm:$0xff]  }
 0x4b4   :  { %4917 = vmatpush3.bf16.msra.mxu0 %v5475_v28  ;;  %v5519_v28 = vld [vmem:[%s7158_s5 + $0x210] sm:$0xff]  }
 0x4b5   :  { %4918 = vmatprep.subr.bf16.mxu0 %v5476_v48  ;;  %v5520_v48 = vld [vmem:[%s7158_s5 + $0x258] sm:$0xff]  }
 0x4b8   :  { %4919 = vmatpush3.bf16.msra.mxu0 %v5477_v51  ;;  %v5522_v51 = vld [vmem:[%s7158_s5 + $0x260] sm:$0xff]  }
 0x4b9   :  { %4920 = vmatprep.subr.bf16.mxu0 %v5478_v52  ;;  %v5523_v52 = vld [vmem:[%s7158_s5 + $0x220] sm:$0xff]  }
 0x4bc   :  { %4921 = vmatpush3.bf16.msra.mxu0 %v5479_v56  ;;  %v5525_v56 = vld [vmem:[%s7158_s5 + $0x228] sm:$0xff]  }
 0x4bd   :  { %4922 = vmatprep.subr.bf16.mxu0 %v5480_v57  ;;  %v5526_v57 = vld [vmem:[%s7158_s5 + $0x270] sm:$0xff]  }
 0x4c0   :  { %4923 = vmatpush3.bf16.msra.mxu0 %v5481_v63  ;;  %v5527_v63 = vld [vmem:[%s7158_s5 + $0x230] sm:$0xff]  }
 0x4c1   :  { %4930 = vmatprep.subr.bf16.mxu0 %v5482_v3  ;;  %v5529_v3 = vld [vmem:[%s7158_s5 + $0x238] sm:$0xff]  }
 0x4c3   :  { %4007 = vmatmul.mubr.bf16.vlgmr.msra.gmra.mrb[12].mxu0 %v3207_v58  ;;  %v5530_v58 = vld [vmem:[%s7160_s7 + $0x40] sm:$0xff]  }
 0x4c4   :  { %4931 = vmatpush3.bf16.msra.mxu0 %v5483_v5  ;;  %4046 = vmatprep.mubr.bf16.mxu0 %v3240_v25  ;;  %v3277_v5 = vrot.slane %v3269_v37, %v5684_v18  ;;  %v5532_v25 = vld [vmem:[%s7160_s7 + $0xc0] sm:$0xff]   ;;  %v5534_v18 = vld [vmem:[%s7160_s7 + $0x48] sm:$0xff]  }
 0x4c5   :  { %4932 = vmatprep.subr.bf16.mxu0 %v5484_v60  ;;  %v5531_v60 = vld [vmem:[%s7160_s7] sm:$0xff]   ;;  %5018 = vmatprep.subr.bf16.mxu1 %v5532_v25 }
 0x4c6   :  { %5019 = vmatpush3.bf16.msra.mxu1 %v5533_v61 }
 0x4c7   :  { %5020 = vmatprep.subr.bf16.mxu1 %v5536_v49 }
 0x4c8   :  { %4933 = vmatpush3.bf16.msra.mxu0 %v5485_v17  ;;  %v5535_v17 = vld [vmem:[%s7160_s7 + $0x8] sm:$0xff]  }
 0x4c9   :  { %4934 = vmatprep.subr.bf16.mxu0 %v5486_v21  ;;  %v5537_v21 = vld [vmem:[%s7160_s7 + $0x88] sm:$0xff]  }
 0x4ca   :  { %5021 = vmatpush3.bf16.msra.mxu1 %v5537_v21 }
 0x4cc   :  { %4935 = vmatpush3.bf16.msra.mxu0 %v5487_v62  ;;  %v5538_v62 = vld [vmem:[%s7160_s7 + $0x50] sm:$0xff]  }
 0x4cd   :  { %4936 = vmatprep.subr.bf16.mxu0 %v5488_v1  ;;  %v5540_v1 = vld [vmem:[%s7160_s7 + $0xd0] sm:$0xff]  }
 0x4ce   :  { %5022 = vmatprep.subr.bf16.mxu1 %v5540_v1 }
 0x4d0   :  { %4937 = vmatpush3.bf16.msra.mxu0 %v5489_v27  ;;  %v5539_v27 = vld [vmem:[%s7160_s7 + $0x10] sm:$0xff]  }
 0x4d1   :  { %4938 = vmatprep.subr.bf16.mxu0 %v5490_v34  ;;  %v5541_v34 = vld [vmem:[%s7160_s7 + $0x90] sm:$0xff]  }
 0x4d2   :  { %5023 = vmatpush3.bf16.msra.mxu1 %v5541_v34  ;;  %v4853_v34 = vld [vmem:[%s7161_s8] ss:$0 sm:$0xff] }
 0x4d4   :  { %4939 = vmatpush3.bf16.msra.mxu0 %v5491_v4  ;;  %v5542_v4 = vld [vmem:[%s7160_s7 + $0x58] sm:$0xff]  }
 0x4d5   :  { %4940 = vmatprep.subr.bf16.mxu0 %v5492_v6  ;;  %v5544_v6 = vld [vmem:[%s7160_s7 + $0xd8] sm:$0xff]  }
 0x4d6   :  { %5024 = vmatprep.subr.bf16.mxu1 %v5544_v6 }
 0x4d8   :  { %4941 = vmatpush3.bf16.msra.mxu0 %v5493_v31  ;;  %v5543_v31 = vld [vmem:[%s7160_s7 + $0x18] sm:$0xff]  }
 0x4d9   :  { %4942 = vmatprep.subr.bf16.mxu0 %v5494_v26  ;;  %v5545_v26 = vld [vmem:[%s7160_s7 + $0x98] sm:$0xff]  }
 0x4da   :  { %5025 = vmatpush3.bf16.msra.mxu1 %v5545_v26 }
 0x4db   :  { %5026 = vmatprep.subr.bf16.mxu1 %v5548_v12 }
 0x4dc   :  { %4943 = vmatpush3.bf16.msra.mxu0 %v5495_v41 }
 0x4dd   :  { %4944 = vmatprep.subr.bf16.mxu0 %v5496_v33  ;;  %v5547_v33 = vld [vmem:[%s7160_s7 + $0x20] sm:$0xff]  }
 0x4e0   :  { %4945 = vmatpush3.bf16.msra.mxu0 %v5497_v7 }
 0x4e1   :  { %4952 = vmatprep.subr.bf16.mxu0 %v5498_v32 }
 0x4e3   :  { %4047 = vmatmul.mubr.bf16.vlgmr.msra.gmra.mrb[16].mxu0 %v3233_v15  ;;  %v5550_v15 = vld [vmem:[%s7160_s7 + $0x68] sm:$0xff]  }
 0x4e4   :  { %4953 = vmatpush3.bf16.msra.mxu0 %v5499_v16  ;;  %4086 = vmatprep.mubr.bf16.mxu0 %v3266_v13  ;;  %v5549_v16 = vld [vmem:[%s7160_s7 + $0xa0] sm:$0xff]   ;;  %v5552_v13 = vld [vmem:[%s7160_s7 + $0xe8] sm:$0xff]  }
 0x4e5   :  { %4954 = vmatprep.subr.bf16.mxu0 %v5500_v40  ;;  %5027 = vmatpush3.bf16.msra.mxu1 %v5549_v16  ;;  %v5551_v40 = vld [vmem:[%s7160_s7 + $0x28] sm:$0xff]  }
 0x4e6   :  { %5028 = vmatprep.subr.bf16.mxu1 %v5552_v13 }
 0x4e8   :  { %4955 = vmatpush3.bf16.msra.mxu0 %v5501_v14  ;;  %v5553_v14 = vld [vmem:[%s7160_s7 + $0xa8] sm:$0xff]  }
 0x4e9   :  { %4956 = vmatprep.subr.bf16.mxu0 %v5502_v19  ;;  %v5554_v19 = vld [vmem:[%s7160_s7 + $0x70] sm:$0xff]   ;;  %5029 = vmatpush3.bf16.msra.mxu1 %v5553_v14 }
 0x4ec   :  { %4957 = vmatpush3.bf16.msra.mxu0 %v5503_v9  ;;  %v5555_v9 = vld [vmem:[%s7160_s7 + $0x30] sm:$0xff]  }
 0x4ed   :  { %4958 = vmatprep.subr.bf16.mxu0 %v5504_v22  ;;  %v5556_v22 = vld [vmem:[%s7160_s7 + $0xf0] sm:$0xff]  }
 0x4ee   :  { %5030 = vmatprep.subr.bf16.mxu1 %v5556_v22 }
 0x4f0   :  { %4959 = vmatpush3.bf16.msra.mxu0 %v5505_v59  ;;  %v5557_v59 = vld [vmem:[%s7160_s7 + $0xb0] sm:$0xff]  }
 0x4f1   :  { %4960 = vmatprep.subr.bf16.mxu0 %v5506_v23  ;;  %v5558_v23 = vld [vmem:[%s7160_s7 + $0x78] sm:$0xff]   ;;  %5031 = vmatpush3.bf16.msra.mxu1 %v5557_v59 }
 0x4f4   :  { %4961 = vmatpush3.bf16.msra.mxu0 %v5507_v24  ;;  %v5560_v24 = vld [vmem:[%s7160_s7 + $0xf8] sm:$0xff]  }
 0x4f5   :  { %4962 = vmatprep.subr.bf16.mxu0 %v5508_v8  ;;  %v5559_v8 = vld [vmem:[%s7160_s7 + $0x38] sm:$0xff]   ;;  %5032 = vmatprep.subr.bf16.mxu1 %v5560_v24 }
 0x4f8   :  { %4963 = vmatpush3.bf16.msra.mxu0 %v5509_v11  ;;  %v5561_v11 = vld [vmem:[%s7160_s7 + $0xb8] sm:$0xff]  }
 0x4f9   :  { %4964 = vmatprep.subr.bf16.mxu0 %v5510_v0  ;;  %5033 = vmatpush3.bf16.msra.mxu1 %v5561_v11  ;;  %v4772_v0 = vld [vmem:[%s7159_s6] ss:$0 sm:$0xff] }
 0x4fc   :  { %4965 = vmatpush3.bf16.msra.mxu0 %v5511_v39 }
 0x4fd   :  { %4966 = vmatprep.subr.bf16.mxu0 %v5512_v43 }
 0x500   :  { %4967 = vmatpush3.bf16.msra.mxu0 %v5513_v20 }
 0x501   :  { %4974 = vmatprep.subr.bf16.mxu0 %v5514_v30 }
 0x503   :  { %4087 = vmatmul.mubr.bf16.vlgmr.msra.gmra.mrb[20].mxu0 %v3259_v42 }
 0x504   :  { %4975 = vmatpush3.bf16.msra.mxu0 %v5515_v38  ;;  %4126 = vmatprep.mubr.bf16.mxu0 %v3284_v55 }
 0x505   :  { %4976 = vmatprep.subr.bf16.mxu0 %v5516_v45 }
 0x508   :  { %4977 = vmatpush3.bf16.msra.mxu0 %v5517_v46 }
 0x509   :  { %4978 = vmatprep.subr.bf16.mxu0 %v5518_v47 }
 0x50c   :  { %4979 = vmatpush3.bf16.msra.mxu0 %v5519_v28 }
 0x50d   :  { %4980 = vmatprep.subr.bf16.mxu0 %v5520_v48 }
 0x510   :  { %4981 = vmatpush3.bf16.msra.mxu0 %v5521_v50 }
 0x511   :  { %4982 = vmatprep.subr.bf16.mxu0 %v5522_v51 }
 0x514   :  { %4983 = vmatpush3.bf16.msra.mxu0 %v5523_v52 }
 0x515   :  { %4984 = vmatprep.subr.bf16.mxu0 %v5524_v54 }
 0x518   :  { %4985 = vmatpush3.bf16.msra.mxu0 %v5525_v56 }
 0x519   :  { %4986 = vmatprep.subr.bf16.mxu0 %v5526_v57 }
 0x51c   :  { %4987 = vmatpush3.bf16.msra.mxu0 %v5527_v63 }
 0x51d   :  { %4988 = vmatprep.subr.bf16.mxu0 %v5528_v2 }
 0x520   :  { %4989 = vmatpush3.bf16.msra.mxu0 %v5529_v3 }
 0x521   :  { %4996 = vmatprep.subr.bf16.mxu0 %v5530_v58 }
 0x523   :  { %4127 = vmatmul.mubr.bf16.vlgmr.msra.gmra.mrb[24].mxu0 %v3277_v5 }
 0x524   :  { %4997 = vmatpush3.bf16.msra.mxu0 %v5531_v60 }
 0x525   :  { %4998 = vmatprep.subr.bf16.mxu0 %v5534_v18 }
 0x528   :  { %4999 = vmatpush3.bf16.msra.mxu0 %v5535_v17 }
 0x529   :  { %5000 = vmatprep.subr.bf16.mxu0 %v5538_v62 }
 0x52c   :  { %5001 = vmatpush3.bf16.msra.mxu0 %v5539_v27 }
 0x52d   :  { %5002 = vmatprep.subr.bf16.mxu0 %v5542_v4 }
 0x530   :  { %5003 = vmatpush3.bf16.msra.mxu0 %v5543_v31 }
 0x531   :  { %5004 = vmatprep.subr.bf16.mxu0 %v5546_v44 }
 0x534   :  { %5005 = vmatpush3.bf16.msra.mxu0 %v5547_v33 }
 0x535   :  { %5006 = vmatprep.subr.bf16.mxu0 %v5550_v15 }
 0x538   :  { %5007 = vmatpush3.bf16.msra.mxu0 %v5551_v40 }
 0x539   :  { %5008 = vmatprep.subr.bf16.mxu0 %v5554_v19 }
 0x53c   :  { %5009 = vmatpush3.bf16.msra.mxu0 %v5555_v9 }
 0x53d   :  { %5010 = vmatprep.subr.bf16.mxu0 %v5558_v23 }
 0x540   :  { %5011 = vmatpush3.bf16.msra.mxu0 %v5559_v8 }
 0x576   :  { %v4902_v41 = vpop.f32.mrb[8].mxu0 }
 0x577   :  { %v4903_v53 = vpop.f32.mrb[9].mxu0 }
 0x578   :  { %v4904_v7 = vadd.f32 %v4903_v53, %v4902_v41  ;;  %v4905_v10 = vpop.f32.mrb[10].mxu0 }
 0x579   :  { %v4906_v32 = vpop.f32.mrb[11].mxu0 }
 0x57a   :  { %v3969_v20 = vadd.f32 %v4904_v7, %v4772_v0 }
 0x596   :  { %v4924_v39 = vpop.f32.mrb[12].mxu0 }
 0x597   :  { %v4925_v43 = vpop.f32.mrb[13].mxu0 }
 0x598   :  { %v4926_v29 = vadd.f32 %v4925_v43, %v4924_v39  ;;  %v4927_v30 = vpop.f32.mrb[14].mxu0 }
 0x599   :  { %v4928_v36 = vpop.f32.mrb[15].mxu0 }
 0x59a   :  { %v4009_v38 = vadd.f32 %v4926_v29, %v3969_v20 }
 0x5b6   :  { %v4946_v42 = vpop.f32.mrb[16].mxu0 }
 0x5b7   :  { %v4947_v45 = vpop.f32.mrb[17].mxu0 }
 0x5b8   :  { %v4948_v55 = vadd.f32 %v4947_v45, %v4946_v42  ;;  %v4949_v46 = vpop.f32.mrb[18].mxu0 }
 0x5b9   :  { %v4950_v47 = vpop.f32.mrb[19].mxu0 }
 0x5ba   :  { %v4049_v28 = vadd.f32 %v4948_v55, %v4009_v38 }
 0x5d6   :  { %v4968_v48 = vpop.f32.mrb[20].mxu0 }
 0x5d7   :  { %v4969_v50 = vpop.f32.mrb[21].mxu0 }
 0x5d8   :  { %v4970_v51 = vadd.f32 %v4969_v50, %v4968_v48  ;;  %v4971_v52 = vpop.f32.mrb[22].mxu0 }
 0x5d9   :  { %v4972_v54 = vpop.f32.mrb[23].mxu0 }
 0x5da   :  { %v4089_v56 = vadd.f32 %v4970_v51, %v4049_v28 }
 0x5f6   :  { %v4990_v57 = vpop.f32.mrb[24].mxu0 }
 0x5f7   :  { %v4991_v63 = vpop.f32.mrb[25].mxu0 }
 0x5f8   :  { %v4992_v2 = vadd.f32 %v4991_v63, %v4990_v57  ;;  %v4993_v3 = vpop.f32.mrb[26].mxu0 }
 0x5f9   :  { %v4994_v37 = vpop.f32.mrb[27].mxu0 }
 0x5fa   :  { %v4129_v5 = vadd.f32 %v4992_v2, %v4089_v56 }
 0x5fc   :  { %v4134_v58 = vmax.f32 %v4129_v5, 0.0 }
 0x5fe   :  { %v4136_v60 = vcombine.high %v4134_v58, %v4134_v58  ;;  %v4143_v25 = vrot.slane %v4134_v58, %v6092_v35 }
 0x600   :  { %v4151_v61 = vcombine.high %v4143_v25, %v4143_v25  ;;  %v4150_v18 = vrot.slane %v4136_v60, %v6092_v35  ;;  %v4157_v21 = vpack.c.bf16 %v4143_v25, %v4143_v25 }
 0x602   :  { %v4158_v49 = vpack.c.bf16 %v4151_v61, %v4151_v61  ;;  %v4152_v17 = vcombine.high %v4150_v18, %v4150_v18  ;;  %v4159_v1 = vpack.c.bf16 %v4150_v18, %v4150_v18 }
 0x604   :  { %4456 = vmatprep.mubr.bf16.mxu0 %v4158_v49  ;;  %v4160_v62 = vpack.c.bf16 %v4152_v17, %v4152_v17 }
 0x605   :  { %4457 = vmatmul.mubr.bf16.vlgmr.msra.gmra.mrb[28].mxu0 %v4157_v21 }
 0x606   :  { %4496 = vmatprep.mubr.bf16.mxu1 %v4160_v62 }
 0x607   :  { %4497 = vmatmul.mubr.bf16.vlgmr.msra.gmra.mrb[4].mxu1 %v4159_v1 }
 0x6d8   :  { %v5012_v27 = vpop.f32.mrb[28].mxu0 }
 0x6d9   :  { %v5013_v4 = vpop.f32.mrb[29].mxu0 }
 0x6da   :  { %v5014_v6 = vadd.f32 %v5013_v4, %v5012_v27  ;;  %v5015_v31 = vpop.f32.mrb[30].mxu0  ;;  %v5034_v26 = vpop.f32.mrb[4].mxu1 }
 0x6db   :  { %v5016_v44 = vpop.f32.mrb[31].mxu0  ;;  %v5035_v35 = vpop.f32.mrb[5].mxu1 }
 0x6dc   :  { %v4459_v41 = vadd.f32 %v5014_v6, %v4853_v34  ;;  %v5036_v33 = vadd.f32 %v5035_v35, %v5034_v26  ;;  %v5037_v53 = vpop.f32.mrb[6].mxu1 }
 0x6dd   :  { %v5038_v7 = vpop.f32.mrb[7].mxu1 }
 0x6de   :  { %v4499_v10 = vadd.f32 %v5036_v33, %v4459_v41 }
 0x6e0   :  { %4505 = vst.msk [vmem:[#allocation2] sm:$0x3] %vm4504_vm2, %v4499_v10 }
 0x6e1   :  { %5573 = shalt.err (!%p5570_p4)
}
 0x6e2   :  { %s5574_s13 = scalar_lea.hbm %s7162_s9, 32 }
 0x6e3   :  { %p5575_p5 = scmp.ne.s32.totalorder %s7162_s9, %s5574_s13  ;;  %p5578_p6 = scmp.lt.u32.totalorder %s5574_s13, %s7162_s9 }
 0x6e5   :  { %p5580_p7 = pnand %p5578_p6, %p5575_p5 }
 0x6e7   :  { %5583 = shalt.err (!%p5580_p7)
}
 0x6e8   :  { %4515 = dma.vmem_to_hbm [thread:$0]  %s4513_s10, 32, %s7162_s9, [#allocation3]  }
 0x6e9   :  { %5584 = dma.done.wait [#allocation3], 32  }
 0x6ea   :  { %5585 = vsyncadd [#allocation3], 4294967264 }
 0x6eb   :  { %4519 = vsyncpa [#allocation3], 1 }

</bundles_post_ra>
